<compile_context>
chip_gen: v7x
topology: tpu7x:2x2x1
jax: 0.10.0
libtpu: 0.0.40
codegen_flags: <defaults>
</compile_context>

<pallas_src>
import jax
import jax.numpy as jnp
from jax.experimental import pallas as pl
from jax.experimental.pallas import tpu as pltpu

D_MODEL = 256
EMBED_DIM = 50
CLASS_SIZE = 5
WEIGHT_SIZE = 4
OUTPUT_DIM = 1
X_DIM = 10 * 10                       # flattened (seq_len * feat) = 100
IN_DIM = X_DIM + EMBED_DIM * 2        # 200
N_RES_LAYERS = 7
EMB_FOLD_ROWS = 16                    # 5 label rows + 4 weight rows + 7 zero pad rows


def _round_up(n, m):
    return ((n + m - 1) // m) * m


def mlp_bc_kernel(x_ref, lab_ref, wgt_ref, embp_ref,
                  wpx_ref, bp_ref, wl_ref, bl_ref, wo_ref, bo_ref, o_ref):
    # x_ref:    (TB, 100) f32          lab_ref/wgt_ref: (TB, 1) i32
    # embp_ref: (16, 256) bf16  (emb tables pre-folded through the projection)
    # wpx_ref:  (100, 256) bf16        bp_ref: (1, 256) f32
    # wl_ref:   (7, 256, 256) bf16     bl_ref: (7, 1, 256) f32
    # wo_ref:   (1, 256) f32           bo_ref: (1, 1) f32
    # o_ref:    (TB, 1) f32
    f32 = jnp.float32
    bf16 = jnp.bfloat16
    tb = x_ref.shape[0]

    # --- combined one-hot over the folded embedding-projection table ---
    # columns 0..4 select the label row, 5..8 select the weight row
    # (rows 9..15 of the table are zero, never selected).
    iota = jax.lax.broadcasted_iota(jnp.int32, (tb, EMB_FOLD_ROWS), 1)
    sel = (lab_ref[...] == iota) | ((wgt_ref[...] + CLASS_SIZE) == iota)
    oh = jnp.where(sel, 1.0, 0.0).astype(bf16)                         # (TB, 16)

    # --- projection: x @ Wp_x + emb contributions + bias, ReLU ---
    h = jnp.dot(x_ref[...].astype(bf16), wpx_ref[...], preferred_element_type=f32)
    h = h + jnp.dot(oh, embp_ref[...], preferred_element_type=f32)
    h = jnp.maximum(h + bp_ref[...], 0.0).astype(bf16)                 # bf16 residual stream

    # --- 7 residual blocks: x = relu(W x + b) + x   (dropout = identity, eval) ---
    for i in range(N_RES_LAYERS):
        a = h                                                          # bf16
        z = jnp.dot(h, wl_ref[i], preferred_element_type=f32)          # f32 accumulate
        h = (jnp.maximum(z + bl_ref[i], 0.0)).astype(bf16) + a         # bf16 residual add

    # --- output head: N=1 matmul -> VPU multiply + lane reduce (XLU) ---
    y = jnp.sum(h.astype(f32) * wo_ref[...], axis=-1, keepdims=True) + bo_ref[...]
    o_ref[...] = jax.nn.sigmoid(y)


@jax.jit
def mlp_bc_forward(x, label, weight, kp):
    """x: (B, seq, feat) f32; label/weight: (B,) int; kp: packed kernel params."""
    B = x.shape[0]
    x_flat = x.reshape(B, -1).astype(jnp.float32)                      # (B, 100)

    # Sublane alignment only (<= 7 pad rows, negligible); ragged tail tiles are
    # handled by the cdiv grid + Pallas boundary masking instead of a full pad.
    Bp = _round_up(B, 8)
    pad = Bp - B
    if pad:
        x_flat = jnp.pad(x_flat, ((0, pad), (0, 0)))
        label = jnp.pad(label, ((0, pad),))
        weight = jnp.pad(weight, ((0, pad),))
    lab = label.astype(jnp.int32).reshape(Bp, 1)
    wgt = weight.astype(jnp.int32).reshape(Bp, 1)

    # Large batch tile (multiple of 8; 512 is a multiple of both 128 and 256 so
    # it matches v5e and v6e/v7x MXU geometry).  Weights stay resident across
    # tiles via constant index_maps.
    TILE_B = min(512, Bp)
    grid = (pl.cdiv(Bp, TILE_B),)
    const2 = lambda i: (0, 0)
    const3 = lambda i: (0, 0, 0)

    out = pl.pallas_call(
        mlp_bc_kernel,
        out_shape=jax.ShapeDtypeStruct((Bp, OUTPUT_DIM), jnp.float32),
        grid_spec=pltpu.PrefetchScalarGridSpec(
            num_scalar_prefetch=0,
            grid=grid,
            in_specs=[
                pl.BlockSpec((TILE_B, X_DIM), lambda i: (i, 0)),             # x
                pl.BlockSpec((TILE_B, 1), lambda i: (i, 0)),                 # label ids
                pl.BlockSpec((TILE_B, 1), lambda i: (i, 0)),                 # weight ids
                pl.BlockSpec((EMB_FOLD_ROWS, D_MODEL), const2),              # folded emb@Wp
                pl.BlockSpec((X_DIM, D_MODEL), const2),                      # W_proj[x rows]
                pl.BlockSpec((1, D_MODEL), const2),                          # b_proj
                pl.BlockSpec((N_RES_LAYERS, D_MODEL, D_MODEL), const3),      # W_lin stack
                pl.BlockSpec((N_RES_LAYERS, 1, D_MODEL), const3),            # b_lin stack
                pl.BlockSpec((1, D_MODEL), const2),                          # w_out row
                pl.BlockSpec((1, OUTPUT_DIM), const2),                       # b_out
            ],
            out_specs=pl.BlockSpec((TILE_B, OUTPUT_DIM), lambda i: (i, 0)),
        ),
        compiler_params=pltpu.CompilerParams(
            dimension_semantics=("parallel",)),
    )(
        x_flat, lab, wgt,
        kp["emb_proj"], kp["wp_x"], kp["b_proj"],
        kp["w_lin"], kp["b_lin"], kp["w_out_row"], kp["b_out"],
    )
    return out[:B, 0]  # x = x[:, 0]


def init_params(key):
    """f32 params in 'math' layout: Linear weight stored as (in_dim, out_dim)."""
    ks = jax.random.split(key, 4 + N_RES_LAYERS)

    def lin_init(k, fan_in, fan_out):
        bound = 1.0 / (fan_in ** 0.5)
        kw, kb = jax.random.split(k)
        w = jax.random.uniform(kw, (fan_in, fan_out), jnp.float32, -bound, bound)
        b = jax.random.uniform(kb, (fan_out,), jnp.float32, -bound, bound)
        return w, b

    w_proj, b_proj = lin_init(ks[0], IN_DIM, D_MODEL)
    wl, bl = zip(*[lin_init(ks[1 + i], D_MODEL, D_MODEL)
                   for i in range(N_RES_LAYERS)])
    w_lin = jnp.stack(wl, axis=0)                      # (7, 256, 256)
    b_lin = jnp.stack(bl, axis=0)                      # (7, 256)
    w_out, b_out = lin_init(ks[1 + N_RES_LAYERS], D_MODEL, OUTPUT_DIM)
    emb1 = jax.random.normal(ks[2 + N_RES_LAYERS], (CLASS_SIZE, EMBED_DIM), jnp.float32)
    emb2 = jax.random.normal(ks[3 + N_RES_LAYERS], (WEIGHT_SIZE, EMBED_DIM), jnp.float32)
    return dict(w_proj=w_proj, b_proj=b_proj, w_lin=w_lin, b_lin=b_lin,
                w_out=w_out, b_out=b_out, emb1=emb1, emb2=emb2)


def pack_params(p):
    """One-time conversion to kernel layout: bf16 dense weights, f32 biases,
    and the embedding tables folded through the projection's row blocks."""
    bf16 = jnp.bfloat16
    wp = p["w_proj"]                                                # (200, 256)
    wp_x = wp[:X_DIM]                                               # (100, 256)
    wp_lab = wp[X_DIM:X_DIM + EMBED_DIM]                            # (50, 256)
    wp_wgt = wp[X_DIM + EMBED_DIM:]                                 # (50, 256)

    # Fold embeddings through the projection in f32, then store bf16.
    emb_lab_p = p["emb1"] @ wp_lab                                  # (5, 256)
    emb_wgt_p = p["emb2"] @ wp_wgt                                  # (4, 256)
    emb_proj = jnp.zeros((EMB_FOLD_ROWS, D_MODEL), jnp.float32)
    emb_proj = emb_proj.at[:CLASS_SIZE].set(emb_lab_p)
    emb_proj = emb_proj.at[CLASS_SIZE:CLASS_SIZE + WEIGHT_SIZE].set(emb_wgt_p)

    return dict(
        emb_proj=emb_proj.astype(bf16),                             # (16, 256)
        wp_x=wp_x.astype(bf16),                                     # (100, 256)
        b_proj=p["b_proj"].reshape(1, D_MODEL),
        w_lin=p["w_lin"].astype(bf16),                              # (7, 256, 256)
        b_lin=p["b_lin"].reshape(N_RES_LAYERS, 1, D_MODEL),
        w_out_row=p["w_out"].reshape(1, D_MODEL),                   # f32, tiny
        b_out=p["b_out"].reshape(1, OUTPUT_DIM),
    )


def mlp_bc_reference(x, label, weight, p):
    """Pure-JAX f32 reference matching the PyTorch module (eval mode)."""
    B = x.shape[0]
    x_flat = x.reshape(B, -1)
    h = jnp.concatenate([x_flat, p["emb1"][label], p["emb2"][weight]], axis=1)
    h = jnp.maximum(h @ p["w_proj"] + p["b_proj"], 0.0)
    for i in range(N_RES_LAYERS):
        a = h
        h = jnp.maximum(h @ p["w_lin"][i] + p["b_lin"][i], 0.0) + a
    y = h @ p["w_out"] + p["b_out"]
    return jax.nn.sigmoid(y)[:, 0]


if __name__ == "__main__":
    key = jax.random.PRNGKey(0)
    k_param, kx, kl, kw = jax.random.split(key, 4)

    params = init_params(k_param)
    kparams = pack_params(params)

    B, SEQ, FEAT = 2, 10, 10  # seq_len * feat must equal 100
    x = jax.random.normal(kx, (B, SEQ, FEAT), jnp.float32)
    label = jax.random.randint(kl, (B,), 0, CLASS_SIZE, jnp.int32)
    weight = jax.random.randint(kw, (B,), 0, WEIGHT_SIZE, jnp.int32)

    out = mlp_bc_forward(x, label, weight, kparams)
    out = jax.block_until_ready(out)

    assert out.shape == (B,), out.shape
    assert bool(jnp.all((out > 0.0) & (out < 1.0)))

    ref = mlp_bc_reference(x, label, weight, params)
    max_err = float(jnp.max(jnp.abs(out - ref)))
    assert max_err < 0.05, f"kernel vs f32 reference mismatch: {max_err}"

    print("KERNEL_OK")
</pallas_src>

<mosaic_0001>
module attributes {stable_mosaic.version = 11 : i64} {
  func.func @mlp_bc_kernel(%arg0: i32, %arg1: memref<8x100xf32, #tpu.memory_space<vmem>>, %arg2: memref<8x1xi32, #tpu.memory_space<vmem>>, %arg3: memref<8x1xi32, #tpu.memory_space<vmem>>, %arg4: memref<16x256xbf16, #tpu.memory_space<vmem>>, %arg5: memref<100x256xbf16, #tpu.memory_space<vmem>>, %arg6: memref<1x256xf32, #tpu.memory_space<vmem>>, %arg7: memref<7x256x256xbf16, #tpu.memory_space<vmem>>, %arg8: memref<7x1x256xf32, #tpu.memory_space<vmem>>, %arg9: memref<1x256xf32, #tpu.memory_space<vmem>>, %arg10: memref<1x1xf32, #tpu.memory_space<vmem>>, %arg11: memref<8x1xf32, #tpu.memory_space<vmem>>) attributes {dimension_semantics = [#tpu.dimension_semantics<parallel>], iteration_bounds = array<i64: 1>, scalar_prefetch = 0 : i64, scratch_operands = 0 : i64, tpu.core_type = #tpu.core_type<tc>, window_params = [{transform_indices = @transform_0, window_bounds = array<i64: 8, 100>}, {transform_indices = @transform_1, window_bounds = array<i64: 8, 1>}, {transform_indices = @transform_2, window_bounds = array<i64: 8, 1>}, {pipeline_mode = #tpu.pipeline_mode<synchronous>, transform_indices = @transform_3, window_bounds = array<i64: 16, 256>}, {pipeline_mode = #tpu.pipeline_mode<synchronous>, transform_indices = @transform_4, window_bounds = array<i64: 100, 256>}, {pipeline_mode = #tpu.pipeline_mode<synchronous>, transform_indices = @transform_5, window_bounds = array<i64: 1, 256>}, {pipeline_mode = #tpu.pipeline_mode<synchronous>, transform_indices = @transform_6, window_bounds = array<i64: 7, 256, 256>}, {pipeline_mode = #tpu.pipeline_mode<synchronous>, transform_indices = @transform_7, window_bounds = array<i64: 7, 1, 256>}, {pipeline_mode = #tpu.pipeline_mode<synchronous>, transform_indices = @transform_8, window_bounds = array<i64: 1, 256>}, {pipeline_mode = #tpu.pipeline_mode<synchronous>, transform_indices = @transform_9, window_bounds = array<i64: 1, 1>}, {transform_indices = @transform_10, window_bounds = array<i64: 8, 1>}]} {
    %0 = tpu.iota {dimensions = array<i32: 1>} : vector<8x16xi32>
    %c0 = arith.constant 0 : index
    %c0_0 = arith.constant 0 : index
    %1 = vector.load %arg2[%c0, %c0_0] : memref<8x1xi32, #tpu.memory_space<vmem>>, vector<8x1xi32>
    %2 = vector.broadcast %1 : vector<8x1xi32> to vector<8x16xi32>
    %3 = arith.cmpi eq, %2, %0 : vector<8x16xi32>
    %c0_1 = arith.constant 0 : index
    %c0_2 = arith.constant 0 : index
    %4 = vector.load %arg3[%c0_1, %c0_2] : memref<8x1xi32, #tpu.memory_space<vmem>>, vector<8x1xi32>
    %c5_i32 = arith.constant 5 : i32
    %5 = vector.broadcast %c5_i32 : i32 to vector<8x1xi32>
    %6 = arith.addi %4, %5 : vector<8x1xi32>
    %7 = vector.broadcast %6 : vector<8x1xi32> to vector<8x16xi32>
    %8 = arith.cmpi eq, %7, %0 : vector<8x16xi32>
    %9 = arith.ori %3, %8 : vector<8x16xi1>
    %cst = arith.constant 1.000000e+00 : f32
    %cst_3 = arith.constant 0.000000e+00 : f32
    %10 = vector.broadcast %cst : f32 to vector<8x16xf32>
    %11 = vector.broadcast %cst_3 : f32 to vector<8x16xf32>
    %12 = arith.select %9, %10, %11 : vector<8x16xi1>, vector<8x16xf32>
    %13 = arith.truncf %12 : vector<8x16xf32> to vector<8x16xbf16>
    %c0_4 = arith.constant 0 : index
    %c0_5 = arith.constant 0 : index
    %14 = vector.load %arg1[%c0_4, %c0_5] : memref<8x100xf32, #tpu.memory_space<vmem>>, vector<8x100xf32>
    %15 = arith.truncf %14 : vector<8x100xf32> to vector<8x100xbf16>
    %c0_6 = arith.constant 0 : index
    %c0_7 = arith.constant 0 : index
    %16 = vector.load %arg5[%c0_6, %c0_7] : memref<100x256xbf16, #tpu.memory_space<vmem>>, vector<100x256xbf16>
    %cst_8 = arith.constant dense<0.000000e+00> : vector<8x256xf32>
    %17 = tpu.matmul %15, %16, %cst_8 {dimension_numbers = #tpu.dot_dimension_numbers<[1], [0], [0], [1], [0, 0, 1, 1], [], []>} : vector<8x100xbf16>, vector<100x256xbf16>, vector<8x256xf32> -> vector<8x256xf32>
    %c0_9 = arith.constant 0 : index
    %c0_10 = arith.constant 0 : index
    %18 = vector.load %arg4[%c0_9, %c0_10] : memref<16x256xbf16, #tpu.memory_space<vmem>>, vector<16x256xbf16>
    %cst_11 = arith.constant dense<0.000000e+00> : vector<8x256xf32>
    %19 = tpu.matmul %13, %18, %cst_11 {dimension_numbers = #tpu.dot_dimension_numbers<[1], [0], [0], [1], [0, 0, 1, 1], [], []>} : vector<8x16xbf16>, vector<16x256xbf16>, vector<8x256xf32> -> vector<8x256xf32>
    %20 = arith.addf %17, %19 : vector<8x256xf32>
    %c0_12 = arith.constant 0 : index
    %c0_13 = arith.constant 0 : index
    %21 = vector.load %arg6[%c0_12, %c0_13] : memref<1x256xf32, #tpu.memory_space<vmem>>, vector<1x256xf32>
    %22 = vector.broadcast %21 : vector<1x256xf32> to vector<8x256xf32>
    %23 = arith.addf %20, %22 : vector<8x256xf32>
    %cst_14 = arith.constant 0.000000e+00 : f32
    %24 = vector.broadcast %cst_14 : f32 to vector<8x256xf32>
    %25 = arith.maximumf %23, %24 : vector<8x256xf32>
    %26 = arith.truncf %25 : vector<8x256xf32> to vector<8x256xbf16>
    %c0_15 = arith.constant 0 : index
    %c0_16 = arith.constant 0 : index
    %c0_17 = arith.constant 0 : index
    %27 = vector.load %arg7[%c0_15, %c0_16, %c0_17] : memref<7x256x256xbf16, #tpu.memory_space<vmem>>, vector<1x256x256xbf16>
    %28 = vector.shape_cast %27 : vector<1x256x256xbf16> to vector<256x256xbf16>
    %cst_18 = arith.constant dense<0.000000e+00> : vector<8x256xf32>
    %29 = tpu.matmul %26, %28, %cst_18 {dimension_numbers = #tpu.dot_dimension_numbers<[1], [0], [0], [1], [0, 0, 1, 1], [], []>} : vector<8x256xbf16>, vector<256x256xbf16>, vector<8x256xf32> -> vector<8x256xf32>
    %c0_19 = arith.constant 0 : index
    %c0_20 = arith.constant 0 : index
    %c0_21 = arith.constant 0 : index
    %30 = vector.load %arg8[%c0_19, %c0_20, %c0_21] : memref<7x1x256xf32, #tpu.memory_space<vmem>>, vector<1x1x256xf32>
    %31 = vector.shape_cast %30 : vector<1x1x256xf32> to vector<1x256xf32>
    %32 = vector.broadcast %31 : vector<1x256xf32> to vector<8x256xf32>
    %33 = arith.addf %29, %32 : vector<8x256xf32>
    %cst_22 = arith.constant 0.000000e+00 : f32
    %34 = vector.broadcast %cst_22 : f32 to vector<8x256xf32>
    %35 = arith.maximumf %33, %34 : vector<8x256xf32>
    %36 = arith.truncf %35 : vector<8x256xf32> to vector<8x256xbf16>
    %37 = arith.addf %36, %26 : vector<8x256xbf16>
    %c1 = arith.constant 1 : index
    %c0_23 = arith.constant 0 : index
    %c0_24 = arith.constant 0 : index
    %38 = vector.load %arg7[%c1, %c0_23, %c0_24] : memref<7x256x256xbf16, #tpu.memory_space<vmem>>, vector<1x256x256xbf16>
    %39 = vector.shape_cast %38 : vector<1x256x256xbf16> to vector<256x256xbf16>
    %cst_25 = arith.constant dense<0.000000e+00> : vector<8x256xf32>
    %40 = tpu.matmul %37, %39, %cst_25 {dimension_numbers = #tpu.dot_dimension_numbers<[1], [0], [0], [1], [0, 0, 1, 1], [], []>} : vector<8x256xbf16>, vector<256x256xbf16>, vector<8x256xf32> -> vector<8x256xf32>
    %c1_26 = arith.constant 1 : index
    %c0_27 = arith.constant 0 : index
    %c0_28 = arith.constant 0 : index
    %41 = vector.load %arg8[%c1_26, %c0_27, %c0_28] : memref<7x1x256xf32, #tpu.memory_space<vmem>>, vector<1x1x256xf32>
    %42 = vector.shape_cast %41 : vector<1x1x256xf32> to vector<1x256xf32>
    %43 = vector.broadcast %42 : vector<1x256xf32> to vector<8x256xf32>
    %44 = arith.addf %40, %43 : vector<8x256xf32>
    %cst_29 = arith.constant 0.000000e+00 : f32
    %45 = vector.broadcast %cst_29 : f32 to vector<8x256xf32>
    %46 = arith.maximumf %44, %45 : vector<8x256xf32>
    %47 = arith.truncf %46 : vector<8x256xf32> to vector<8x256xbf16>
    %48 = arith.addf %47, %37 : vector<8x256xbf16>
    %c2 = arith.constant 2 : index
    %c0_30 = arith.constant 0 : index
    %c0_31 = arith.constant 0 : index
    %49 = vector.load %arg7[%c2, %c0_30, %c0_31] : memref<7x256x256xbf16, #tpu.memory_space<vmem>>, vector<1x256x256xbf16>
    %50 = vector.shape_cast %49 : vector<1x256x256xbf16> to vector<256x256xbf16>
    %cst_32 = arith.constant dense<0.000000e+00> : vector<8x256xf32>
    %51 = tpu.matmul %48, %50, %cst_32 {dimension_numbers = #tpu.dot_dimension_numbers<[1], [0], [0], [1], [0, 0, 1, 1], [], []>} : vector<8x256xbf16>, vector<256x256xbf16>, vector<8x256xf32> -> vector<8x256xf32>
    %c2_33 = arith.constant 2 : index
    %c0_34 = arith.constant 0 : index
    %c0_35 = arith.constant 0 : index
    %52 = vector.load %arg8[%c2_33, %c0_34, %c0_35] : memref<7x1x256xf32, #tpu.memory_space<vmem>>, vector<1x1x256xf32>
    %53 = vector.shape_cast %52 : vector<1x1x256xf32> to vector<1x256xf32>
    %54 = vector.broadcast %53 : vector<1x256xf32> to vector<8x256xf32>
    %55 = arith.addf %51, %54 : vector<8x256xf32>
    %cst_36 = arith.constant 0.000000e+00 : f32
    %56 = vector.broadcast %cst_36 : f32 to vector<8x256xf32>
    %57 = arith.maximumf %55, %56 : vector<8x256xf32>
    %58 = arith.truncf %57 : vector<8x256xf32> to vector<8x256xbf16>
    %59 = arith.addf %58, %48 : vector<8x256xbf16>
    %c3 = arith.constant 3 : index
    %c0_37 = arith.constant 0 : index
    %c0_38 = arith.constant 0 : index
    %60 = vector.load %arg7[%c3, %c0_37, %c0_38] : memref<7x256x256xbf16, #tpu.memory_space<vmem>>, vector<1x256x256xbf16>
    %61 = vector.shape_cast %60 : vector<1x256x256xbf16> to vector<256x256xbf16>
    %cst_39 = arith.constant dense<0.000000e+00> : vector<8x256xf32>
    %62 = tpu.matmul %59, %61, %cst_39 {dimension_numbers = #tpu.dot_dimension_numbers<[1], [0], [0], [1], [0, 0, 1, 1], [], []>} : vector<8x256xbf16>, vector<256x256xbf16>, vector<8x256xf32> -> vector<8x256xf32>
    %c3_40 = arith.constant 3 : index
    %c0_41 = arith.constant 0 : index
    %c0_42 = arith.constant 0 : index
    %63 = vector.load %arg8[%c3_40, %c0_41, %c0_42] : memref<7x1x256xf32, #tpu.memory_space<vmem>>, vector<1x1x256xf32>
    %64 = vector.shape_cast %63 : vector<1x1x256xf32> to vector<1x256xf32>
    %65 = vector.broadcast %64 : vector<1x256xf32> to vector<8x256xf32>
    %66 = arith.addf %62, %65 : vector<8x256xf32>
    %cst_43 = arith.constant 0.000000e+00 : f32
    %67 = vector.broadcast %cst_43 : f32 to vector<8x256xf32>
    %68 = arith.maximumf %66, %67 : vector<8x256xf32>
    %69 = arith.truncf %68 : vector<8x256xf32> to vector<8x256xbf16>
    %70 = arith.addf %69, %59 : vector<8x256xbf16>
    %c4 = arith.constant 4 : index
    %c0_44 = arith.constant 0 : index
    %c0_45 = arith.constant 0 : index
    %71 = vector.load %arg7[%c4, %c0_44, %c0_45] : memref<7x256x256xbf16, #tpu.memory_space<vmem>>, vector<1x256x256xbf16>
    %72 = vector.shape_cast %71 : vector<1x256x256xbf16> to vector<256x256xbf16>
    %cst_46 = arith.constant dense<0.000000e+00> : vector<8x256xf32>
    %73 = tpu.matmul %70, %72, %cst_46 {dimension_numbers = #tpu.dot_dimension_numbers<[1], [0], [0], [1], [0, 0, 1, 1], [], []>} : vector<8x256xbf16>, vector<256x256xbf16>, vector<8x256xf32> -> vector<8x256xf32>
    %c4_47 = arith.constant 4 : index
    %c0_48 = arith.constant 0 : index
    %c0_49 = arith.constant 0 : index
    %74 = vector.load %arg8[%c4_47, %c0_48, %c0_49] : memref<7x1x256xf32, #tpu.memory_space<vmem>>, vector<1x1x256xf32>
    %75 = vector.shape_cast %74 : vector<1x1x256xf32> to vector<1x256xf32>
    %76 = vector.broadcast %75 : vector<1x256xf32> to vector<8x256xf32>
    %77 = arith.addf %73, %76 : vector<8x256xf32>
    %cst_50 = arith.constant 0.000000e+00 : f32
    %78 = vector.broadcast %cst_50 : f32 to vector<8x256xf32>
    %79 = arith.maximumf %77, %78 : vector<8x256xf32>
    %80 = arith.truncf %79 : vector<8x256xf32> to vector<8x256xbf16>
    %81 = arith.addf %80, %70 : vector<8x256xbf16>
    %c5 = arith.constant 5 : index
    %c0_51 = arith.constant 0 : index
    %c0_52 = arith.constant 0 : index
    %82 = vector.load %arg7[%c5, %c0_51, %c0_52] : memref<7x256x256xbf16, #tpu.memory_space<vmem>>, vector<1x256x256xbf16>
    %83 = vector.shape_cast %82 : vector<1x256x256xbf16> to vector<256x256xbf16>
    %cst_53 = arith.constant dense<0.000000e+00> : vector<8x256xf32>
    %84 = tpu.matmul %81, %83, %cst_53 {dimension_numbers = #tpu.dot_dimension_numbers<[1], [0], [0], [1], [0, 0, 1, 1], [], []>} : vector<8x256xbf16>, vector<256x256xbf16>, vector<8x256xf32> -> vector<8x256xf32>
    %c5_54 = arith.constant 5 : index
    %c0_55 = arith.constant 0 : index
    %c0_56 = arith.constant 0 : index
    %85 = vector.load %arg8[%c5_54, %c0_55, %c0_56] : memref<7x1x256xf32, #tpu.memory_space<vmem>>, vector<1x1x256xf32>
    %86 = vector.shape_cast %85 : vector<1x1x256xf32> to vector<1x256xf32>
    %87 = vector.broadcast %86 : vector<1x256xf32> to vector<8x256xf32>
    %88 = arith.addf %84, %87 : vector<8x256xf32>
    %cst_57 = arith.constant 0.000000e+00 : f32
    %89 = vector.broadcast %cst_57 : f32 to vector<8x256xf32>
    %90 = arith.maximumf %88, %89 : vector<8x256xf32>
    %91 = arith.truncf %90 : vector<8x256xf32> to vector<8x256xbf16>
    %92 = arith.addf %91, %81 : vector<8x256xbf16>
    %c6 = arith.constant 6 : index
    %c0_58 = arith.constant 0 : index
    %c0_59 = arith.constant 0 : index
    %93 = vector.load %arg7[%c6, %c0_58, %c0_59] : memref<7x256x256xbf16, #tpu.memory_space<vmem>>, vector<1x256x256xbf16>
    %94 = vector.shape_cast %93 : vector<1x256x256xbf16> to vector<256x256xbf16>
    %cst_60 = arith.constant dense<0.000000e+00> : vector<8x256xf32>
    %95 = tpu.matmul %92, %94, %cst_60 {dimension_numbers = #tpu.dot_dimension_numbers<[1], [0], [0], [1], [0, 0, 1, 1], [], []>} : vector<8x256xbf16>, vector<256x256xbf16>, vector<8x256xf32> -> vector<8x256xf32>
    %c6_61 = arith.constant 6 : index
    %c0_62 = arith.constant 0 : index
    %c0_63 = arith.constant 0 : index
    %96 = vector.load %arg8[%c6_61, %c0_62, %c0_63] : memref<7x1x256xf32, #tpu.memory_space<vmem>>, vector<1x1x256xf32>
    %97 = vector.shape_cast %96 : vector<1x1x256xf32> to vector<1x256xf32>
    %98 = vector.broadcast %97 : vector<1x256xf32> to vector<8x256xf32>
    %99 = arith.addf %95, %98 : vector<8x256xf32>
    %cst_64 = arith.constant 0.000000e+00 : f32
    %100 = vector.broadcast %cst_64 : f32 to vector<8x256xf32>
    %101 = arith.maximumf %99, %100 : vector<8x256xf32>
    %102 = arith.truncf %101 : vector<8x256xf32> to vector<8x256xbf16>
    %103 = arith.addf %102, %92 : vector<8x256xbf16>
    %104 = arith.extf %103 : vector<8x256xbf16> to vector<8x256xf32>
    %c0_65 = arith.constant 0 : index
    %c0_66 = arith.constant 0 : index
    %105 = vector.load %arg9[%c0_65, %c0_66] : memref<1x256xf32, #tpu.memory_space<vmem>>, vector<1x256xf32>
    %106 = vector.broadcast %105 : vector<1x256xf32> to vector<8x256xf32>
    %107 = arith.mulf %104, %106 : vector<8x256xf32>
    %cst_67 = arith.constant dense<0.000000e+00> : vector<8xf32>
    %108 = vector.multi_reduction <add>, %107, %cst_67 [1] : vector<8x256xf32> to vector<8xf32>
    %109 = vector.shape_cast %108 : vector<8xf32> to vector<8x1xf32>
    %c0_68 = arith.constant 0 : index
    %c0_69 = arith.constant 0 : index
    %110 = vector.load %arg10[%c0_68, %c0_69] : memref<1x1xf32, #tpu.memory_space<vmem>>, vector<1x1xf32>
    %111 = vector.broadcast %110 : vector<1x1xf32> to vector<8x1xf32>
    %112 = arith.addf %109, %111 : vector<8x1xf32>
    %113 = arith.negf %112 : vector<8x1xf32>
    %114 = math.exp %113 : vector<8x1xf32>
    %cst_70 = arith.constant 1.000000e+00 : f32
    %115 = vector.broadcast %cst_70 : f32 to vector<8x1xf32>
    %116 = arith.addf %115, %114 : vector<8x1xf32>
    %117 = arith.divf %115, %116 : vector<8x1xf32>
    %c0_71 = arith.constant 0 : index
    %c0_72 = arith.constant 0 : index
    %118 = vector.load %arg11[%c0_71, %c0_72] : memref<8x1xf32, #tpu.memory_space<vmem>>, vector<8x1xf32>
    tpu.vector_store %arg11[%c0_71, %c0_72], %117 {strides = array<i32>} : memref<8x1xf32, #tpu.memory_space<vmem>>, vector<8x1xf32>,
    return
  }
  func.func @transform_0(%arg0: i32) -> (i32, i32) {
    %c0_i32 = arith.constant 0 : i32
    %c0_i32_0 = arith.constant 0 : i32
    return %arg0, %c0_i32 : i32, i32
  }
  func.func @transform_1(%arg0: i32) -> (i32, i32) {
    %c0_i32 = arith.constant 0 : i32
    %c0_i32_0 = arith.constant 0 : i32
    return %arg0, %c0_i32 : i32, i32
  }
  func.func @transform_2(%arg0: i32) -> (i32, i32) {
    %c0_i32 = arith.constant 0 : i32
    %c0_i32_0 = arith.constant 0 : i32
    return %arg0, %c0_i32 : i32, i32
  }
  func.func @transform_3(%arg0: i32) -> (i32, i32) {
    %c0_i32 = arith.constant 0 : i32
    %c0_i32_0 = arith.constant 0 : i32
    %c0_i32_1 = arith.constant 0 : i32
    return %c0_i32, %c0_i32_0 : i32, i32
  }
  func.func @transform_4(%arg0: i32) -> (i32, i32) {
    %c0_i32 = arith.constant 0 : i32
    %c0_i32_0 = arith.constant 0 : i32
    %c0_i32_1 = arith.constant 0 : i32
    return %c0_i32, %c0_i32_0 : i32, i32
  }
  func.func @transform_5(%arg0: i32) -> (i32, i32) {
    %c0_i32 = arith.constant 0 : i32
    %c0_i32_0 = arith.constant 0 : i32
    %c0_i32_1 = arith.constant 0 : i32
    return %c0_i32, %c0_i32_0 : i32, i32
  }
  func.func @transform_6(%arg0: i32) -> (i32, i32, i32) {
    %c0_i32 = arith.constant 0 : i32
    %c0_i32_0 = arith.constant 0 : i32
    %c0_i32_1 = arith.constant 0 : i32
    %c0_i32_2 = arith.constant 0 : i32
    return %c0_i32, %c0_i32_0, %c0_i32_1 : i32, i32, i32
  }
  func.func @transform_7(%arg0: i32) -> (i32, i32, i32) {
    %c0_i32 = arith.constant 0 : i32
    %c0_i32_0 = arith.constant 0 : i32
    %c0_i32_1 = arith.constant 0 : i32
    %c0_i32_2 = arith.constant 0 : i32
    return %c0_i32, %c0_i32_0, %c0_i32_1 : i32, i32, i32
  }
  func.func @transform_8(%arg0: i32) -> (i32, i32) {
    %c0_i32 = arith.constant 0 : i32
    %c0_i32_0 = arith.constant 0 : i32
    %c0_i32_1 = arith.constant 0 : i32
    return %c0_i32, %c0_i32_0 : i32, i32
  }
  func.func @transform_9(%arg0: i32) -> (i32, i32) {
    %c0_i32 = arith.constant 0 : i32
    %c0_i32_0 = arith.constant 0 : i32
    %c0_i32_1 = arith.constant 0 : i32
    return %c0_i32, %c0_i32_0 : i32, i32
  }
  func.func @transform_10(%arg0: i32) -> (i32, i32) {
    %c0_i32 = arith.constant 0 : i32
    %c0_i32_0 = arith.constant 0 : i32
    return %arg0, %c0_i32 : i32, i32
  }
}

</mosaic_0001>

<bundles_post_ra>
// kernel: mlp_bc_forward.1
= control target key start
LH: loop header
LB: loop body
LE: loop exit
PB: predicated region body
PF: predicated region fallthrough
CT: control target
= control target key end

     0   :  { %s2999_s0 = inlined_call_operand.vmem [shape: f32[8,100], index: 0, kind: input, shape index: {}]   ;;  %s3000_s1 = inlined_call_operand.vmem [shape: s32[8,1], index: 1, kind: input, shape index: {}]   ;;  %s3001_s2 = inlined_call_operand.vmem [shape: s32[8,1], index: 2, kind: input, shape index: {}]   ;;  %s3002_s3 = inlined_call_operand.vmem [shape: bf16[16,256], index: 3, kind: input, shape index: {}]   ;;  %s3003_s4 = inlined_call_operand.vmem [shape: bf16[100,256], index: 4, kind: input, shape index: {}]   ;;  %s3004_s5 = inlined_call_operand.vmem [shape: f32[1,256], index: 5, kind: input, shape index: {}]   ;;  %s3005_s6 = inlined_call_operand.hbm [shape: bf16[7,256,256], index: 6, kind: input, shape index: {}]   ;;  %s3006_s7 = inlined_call_operand.vmem [shape: f32[7,1,256], index: 7, kind: input, shape index: {}]   ;;  %s3007_s8 = inlined_call_operand.hbm [shape: f32[1,256], index: 8, kind: input, shape index: {}]   ;;  %s3008_s9 = inlined_call_operand.<no memory space> [shape: f32[1,1], index: 9, kind: input, shape index: {}]   ;;  %s3009_s10 = inlined_call_operand.vmem [shape: f32[8,1], index: 10, kind: output, shape index: {}]  }
   0x1   :  { %v15_v0 = vstv %s3008_s9 }
   0x2   :  { %16 = vst [vmem:[#allocation2] sm:$0x1] %v15_v0 }
   0x3   :  { %17 = vsyncpa [#allocation4], 0 }
   0x4   :  { %18 = vsyncpa [#allocation6], 0  ;;  %s2766_s15 = smov [#allocation3]   ;;  %s2718_s19 = scalar_lea.hbm %s3005_s6, 28672 }
   0x5   :  { %s36_s16 = sshll.u32 %s2766_s15, 4  ;;  %p2719_p0 = scmp.ne.s32.totalorder %s3005_s6, %s2718_s19  ;;  %s37_s16 = int_to_ptr.vmem [resolvable:$true] %s36_s16 }
   0x6   :  { %p2722_p1 = scmp.lt.u32.totalorder %s2718_s19, %s3005_s6 }
   0x8   :  { %p2724_p2 = pnand %p2722_p1, %p2719_p0 }
   0xa   :  { %2727 = shalt.err (!%p2724_p2)
}
   0xb   :  { %s2728_s9 = scalar_lea.vmem %s37_s16, 28672  ;;  %p2733_p4 = scmp.lt.s32.totalorder %s37_s16, %s37_s16 }
   0xc   :  { %p2729_p3 = scmp.ne.s32.totalorder %s37_s16, %s2728_s9  ;;  %p2734_p5 = scmp.lt.s32.totalorder %s2728_s9, %s2728_s9 }
   0xe   :  { %p2735_p6 = por %p2734_p5, %p2733_p4 }
  0x10   :  { %p2736_p7 = pnand %p2735_p6, %p2729_p3 }
  0x12   :  { %2739 = shalt.err (!%p2736_p7)
}
  0x13   :  { %s2767_s24 = smov 128   ;;  %s2768_s25 = smov 8  }
  0x14   :  { %42 = dma.hbm_to_vmem [thread:$0]  %s3005_s6, 28672, %s37_s16, [#allocation4], %s2767_s24, %s2767_s24, %s2768_s25  }
  0x15   :  { %s2769_s28 = smov [#allocation5]   ;;  %s2740_s12 = scalar_lea.hbm %s3007_s8, 32 }
  0x16   :  { %s51_s29 = sshll.u32 %s2769_s28, 4  ;;  %p2741_p8 = scmp.ne.s32.totalorder %s3007_s8, %s2740_s12  ;;  %s52_s29 = int_to_ptr.vmem [resolvable:$true] %s51_s29 }
  0x17   :  { %p2744_p9 = scmp.lt.u32.totalorder %s2740_s12, %s3007_s8 }
  0x19   :  { %p2746_p10 = pnand %p2744_p9, %p2741_p8 }
  0x1b   :  { %2749 = shalt.err (!%p2746_p10)
}
  0x1c   :  { %s2750_s18 = scalar_lea.vmem %s52_s29, 32  ;;  %p2755_p12 = scmp.lt.s32.totalorder %s52_s29, %s52_s29 }
  0x1d   :  { %p2751_p11 = scmp.ne.s32.totalorder %s52_s29, %s2750_s18  ;;  %p2756_p13 = scmp.lt.s32.totalorder %s2750_s18, %s2750_s18 }
  0x1f   :  { %p2757_p0 = por %p2756_p13, %p2755_p12 }
  0x21   :  { %p2758_p1 = pnand %p2757_p0, %p2751_p11 }
  0x23   :  { %2761 = shalt.err (!%p2758_p1)
}
  0x24   :  { %54 = dma.hbm_to_vmem [thread:$0]  %s3007_s8, 32, %s52_s29, [#allocation6]  }
  0x25   :  { %2762 = dma.done.wait [#allocation4], 28672  }
  0x26   :  { %2763 = vsyncadd [#allocation4], 4294938624 }
  0x27   :  { %2764 = dma.done.wait [#allocation6], 32  }
  0x28   :  { %2765 = vsyncadd [#allocation6], 4294967264  ;;  %v2770_v1 = vmov 0   ;;  %v66_v2 = vld [vmem:[%s3000_s1] sm:$0xff]  ;;  %v2383_v11 = vld [vmem:[#allocation3 + $0x10] ss:$8 sps:$4 sm:$0xff]   ;;  %v64_v22 = vlaneseq }
  0x29   :  { %2354 = vset.pattern.permute.xlu0 %v2770_v1  ;;  %143 = vmatprep.mubr.bf16.mxu1 %v2770_v1  ;;  %v71_v3 = vld [vmem:[%s3001_s2] sm:$0xff]  ;;  %v2389_v15 = vld [vmem:[#allocation3 + $0x30] ss:$8 sps:$4 sm:$0xff]   ;;  %v2771_v26 = vmov 0.0   ;;  %vm107_vm3 = vcmask 130048   ;;  %vm221_vm4 = vcmask 1041408  }
  0x2a   :  { %68 = vperm.xlu0 %2354, %v66_v2   ;;  %v72_v4 = vadd.s32 5, %v71_v3  ;;  %v2355_v5 = vld [vmem:[%s3002_s3 + $0x4] ss:$8 sps:$4 sm:$0xff]   ;;  %v2357_v6 = vld [vmem:[%s3002_s3] ss:$8 sps:$4 sm:$0xff]   ;;  %v65_v24 = vand.u32 127, %v64_v22 }
  0x2b   :  { %111 = vmatprep.subr.bf16.mxu1 %v2355_v5  ;;  %v2360_v7 = vld [vmem:[%s3003_s4 + $0x4] ss:$8 sps:$4 sm:$0xff]   ;;  %v2381_v10 = vld [vmem:[#allocation3 + $0x14] ss:$8 sps:$4 sm:$0xff]   ;;  %v2395_v19 = vld [vmem:[#allocation3 + $0x50] ss:$8 sps:$4 sm:$0xff]  }
  0x2c   :  { %112 = vmatpush1.bf16.msra.mxu1 %v2357_v6  ;;  %v2378_v8 = vld [vmem:[#allocation3 + $0x4] ss:$8 sps:$4 sm:$0xff]   ;;  %v2380_v9 = vld [vmem:[#allocation3] ss:$8 sps:$4 sm:$0xff]   ;;  %v2387_v14 = vld [vmem:[#allocation3 + $0x34] ss:$8 sps:$4 sm:$0xff]  }
  0x2d   :  { %228 = vmatprep.subr.bf16.mxu1 %v2360_v7  ;;  %491 = vmatprep.subr.bf16.mxu0 %v2378_v8  ;;  %v2384_v12 = vld [vmem:[#allocation3 + $0x24] ss:$8 sps:$4 sm:$0xff]   ;;  %v2386_v13 = vld [vmem:[#allocation3 + $0x20] ss:$8 sps:$4 sm:$0xff]   ;;  %v2393_v18 = vld [vmem:[#allocation3 + $0x54] ss:$8 sps:$4 sm:$0xff]  }
  0x2e   :  { %74 = vperm.xlu0 %2354, %v72_v4   ;;  %492 = vmatpush1.bf16.msra.mxu0 %v2380_v9  ;;  %v2390_v16 = vld [vmem:[#allocation3 + $0x44] ss:$8 sps:$4 sm:$0xff]   ;;  %v2392_v17 = vld [vmem:[#allocation3 + $0x40] ss:$8 sps:$4 sm:$0xff]   ;;  %v2363_v30 = vld [vmem:[%s3003_s4 + $0x14] ss:$8 sps:$4 sm:$0xff]  }
  0x2f   :  { %493 = vmatprep.subr.bf16.mxu0 %v2381_v10  ;;  %v2396_v20 = vld [vmem:[#allocation3 + $0x64] ss:$8 sps:$4 sm:$0xff]   ;;  %v2398_v21 = vld [vmem:[#allocation3 + $0x60] ss:$8 sps:$4 sm:$0xff]   ;;  %v2369_v34 = vld [vmem:[%s3003_s4 + $0x34] ss:$8 sps:$4 sm:$0xff]  }
  0x30   :  { %v2358_v28 = vld [vmem:[%s3003_s4] ss:$8 sps:$4 sm:$0xff]   ;;  %v2361_v31 = vld [vmem:[%s3003_s4 + $0x10] ss:$8 sps:$4 sm:$0xff]   ;;  %v2366_v32 = vld [vmem:[%s3003_s4 + $0x24] ss:$8 sps:$4 sm:$0xff]  }
  0x31   :  { %v2364_v33 = vld [vmem:[%s3003_s4 + $0x20] ss:$8 sps:$4 sm:$0xff]   ;;  %v2367_v35 = vld [vmem:[%s3003_s4 + $0x30] ss:$8 sps:$4 sm:$0xff]   ;;  %v2372_v36 = vld [vmem:[%s3003_s4 + $0x44] ss:$8 sps:$4 sm:$0xff]  }
  0x32   :  { %494 = vmatpush1.bf16.msra.mxu0 %v2383_v11  ;;  %v2370_v37 = vld [vmem:[%s3003_s4 + $0x40] ss:$8 sps:$4 sm:$0xff]   ;;  %v2375_v38 = vld [vmem:[%s3003_s4 + $0x54] ss:$8 sps:$4 sm:$0xff]   ;;  %v2373_v40 = vld [vmem:[%s3003_s4 + $0x50] ss:$8 sps:$4 sm:$0xff]  }
  0x33   :  { %495 = vmatprep.subr.bf16.mxu0 %v2384_v12  ;;  %v94_v39 = vld [vmem:[%s3003_s4 + $0x60] sm:$0x33]  ;;  %vm217_vm5 = vcmask 818176   ;;  %v2401_v47 = vld [vmem:[#allocation3 + $0x70] ss:$8 sps:$4 sm:$0xff]   ;;  %vm2089_vm6 = vcmask 7168  }
  0x34   :  { %v2113_v41 = vcombine.high %v94_v39, %v94_v39  ;;  %v2112_v42 = vcombine.low %v94_v39, %v94_v39  ;;  %v80_v43 = vld [vmem:[%s2999_s0] sm:$0xff]  ;;  %v2407_v51 = vld [vmem:[#allocation3 + $0x90] ss:$8 sps:$4 sm:$0xff]  }
  0x35   :  { %v81_v45 = vpack.c.bf16 %v80_v43, %v80_v43  ;;  %v2399_v46 = vld [vmem:[#allocation3 + $0x74] ss:$8 sps:$4 sm:$0xff]   ;;  %v2402_v48 = vld [vmem:[#allocation3 + $0x84] ss:$8 sps:$4 sm:$0xff]   ;;  %v2404_v49 = vld [vmem:[#allocation3 + $0x80] ss:$8 sps:$4 sm:$0xff]  }
  0x36   :  { %496 = vmatpush1.bf16.msra.mxu0 %v2386_v13  ;;  %v223_v44 = vsel %vm221_vm4, %v2112_v42, 0  ;;  %v2405_v50 = vld [vmem:[#allocation3 + $0x94] ss:$8 sps:$4 sm:$0xff]   ;;  %v2408_v52 = vld [vmem:[#allocation3 + $0xa4] ss:$8 sps:$4 sm:$0xff]  }
  0x37   :  { %497 = vmatprep.subr.bf16.mxu0 %v2387_v14  ;;  %v2410_v53 = vld [vmem:[#allocation3 + $0xa0] ss:$8 sps:$4 sm:$0xff]   ;;  %v2411_v54 = vld [vmem:[#allocation3 + $0xb4] ss:$8 sps:$4 sm:$0xff]   ;;  %v2413_v55 = vld [vmem:[#allocation3 + $0xb0] ss:$8 sps:$4 sm:$0xff]  }
  0x38   :  { %v2414_v56 = vld [vmem:[#allocation3 + $0xc4] ss:$8 sps:$4 sm:$0xff]   ;;  %v2416_v57 = vld [vmem:[#allocation3 + $0xc0] ss:$8 sps:$4 sm:$0xff]   ;;  %v2417_v58 = vld [vmem:[#allocation3 + $0xd4] ss:$8 sps:$4 sm:$0xff]  }
  0x39   :  { %v2419_v59 = vld [vmem:[#allocation3 + $0xd0] ss:$8 sps:$4 sm:$0xff]   ;;  %v2420_v60 = vld [vmem:[#allocation3 + $0xe4] ss:$8 sps:$4 sm:$0xff]   ;;  %v2422_v61 = vld [vmem:[#allocation3 + $0xe0] ss:$8 sps:$4 sm:$0xff]  }
  0x3a   :  { %498 = vmatpush1.bf16.msra.mxu0 %v2389_v15  ;;  %v2423_v62 = vld [vmem:[#allocation3 + $0xf4] ss:$8 sps:$4 sm:$0xff]   ;;  %v2425_v63 = vld [vmem:[#allocation3 + $0xf0] ss:$8 sps:$4 sm:$0xff]   ;;  %v2426_v0 = vld [vmem:[#allocation3 + $0x100] ss:$8 sps:$4 sm:$0xff]  }
  0x3b   :  { %499 = vmatprep.subr.bf16.mxu0 %v2390_v16  ;;  %v2431_v2 = vld [vmem:[#allocation3 + $0x114] ss:$8 sps:$4 sm:$0xff]   ;;  %v2429_v3 = vld [vmem:[#allocation3 + $0x110] ss:$8 sps:$4 sm:$0xff]   ;;  %v2434_v4 = vld [vmem:[#allocation3 + $0x124] ss:$8 sps:$4 sm:$0xff]  }
  0x3c   :  { %v2432_v5 = vld [vmem:[#allocation3 + $0x120] ss:$8 sps:$4 sm:$0xff]   ;;  %v2437_v6 = vld [vmem:[#allocation3 + $0x134] ss:$8 sps:$4 sm:$0xff]   ;;  %v2435_v7 = vld [vmem:[#allocation3 + $0x130] ss:$8 sps:$4 sm:$0xff]  }
  0x3d   :  { %v2440_v8 = vld [vmem:[#allocation3 + $0x144] ss:$8 sps:$4 sm:$0xff]   ;;  %v2438_v9 = vld [vmem:[#allocation3 + $0x140] ss:$8 sps:$4 sm:$0xff]   ;;  %v2443_v10 = vld [vmem:[#allocation3 + $0x154] ss:$8 sps:$4 sm:$0xff]  }
  0x3e   :  { %500 = vmatpush1.bf16.msra.mxu0 %v2392_v17  ;;  %v2441_v11 = vld [vmem:[#allocation3 + $0x150] ss:$8 sps:$4 sm:$0xff]   ;;  %v2446_v12 = vld [vmem:[#allocation3 + $0x164] ss:$8 sps:$4 sm:$0xff]   ;;  %v2444_v13 = vld [vmem:[#allocation3 + $0x160] ss:$8 sps:$4 sm:$0xff]  }
  0x3f   :  { %501 = vmatprep.subr.bf16.mxu0 %v2393_v18  ;;  %v2449_v14 = vld [vmem:[#allocation3 + $0x174] ss:$8 sps:$4 sm:$0xff]   ;;  %v2447_v15 = vld [vmem:[#allocation3 + $0x170] ss:$8 sps:$4 sm:$0xff]   ;;  %v2452_v16 = vld [vmem:[#allocation3 + $0x184] ss:$8 sps:$4 sm:$0xff]  }
  0x40   :  { %v2450_v17 = vld [vmem:[#allocation3 + $0x180] ss:$8 sps:$4 sm:$0xff]   ;;  %v2455_v18 = vld [vmem:[#allocation3 + $0x194] ss:$8 sps:$4 sm:$0xff]  }
  0x42   :  { %502 = vmatpush1.bf16.msra.mxu0 %v2395_v19  ;;  %v2453_v19 = vld [vmem:[#allocation3 + $0x190] ss:$8 sps:$4 sm:$0xff]  }
  0x43   :  { %503 = vmatprep.subr.bf16.mxu0 %v2396_v20  ;;  %v2458_v20 = vld [vmem:[#allocation3 + $0x1a4] ss:$8 sps:$4 sm:$0xff]  }
  0x46   :  { %504 = vmatpush1.bf16.msra.mxu0 %v2398_v21  ;;  %v2456_v21 = vld [vmem:[#allocation3 + $0x1a0] ss:$8 sps:$4 sm:$0xff]  }
  0x47   :  { %505 = vmatprep.subr.bf16.mxu0 %v2399_v46 }
  0x4a   :  { %506 = vmatpush1.bf16.msra.mxu0 %v2401_v47 }
  0x4b   :  { %507 = vmatprep.subr.bf16.mxu0 %v2402_v48 }
  0x4e   :  { %508 = vmatpush1.bf16.msra.mxu0 %v2404_v49 }
  0x4f   :  { %509 = vmatprep.subr.bf16.mxu0 %v2405_v50  ;;  %v2470_v50 = vld [vmem:[#allocation3 + $0x1e4] ss:$8 sps:$4 sm:$0xff]  }
  0x52   :  { %510 = vmatpush1.bf16.msra.mxu0 %v2407_v51  ;;  %v2468_v51 = vld [vmem:[#allocation3 + $0x1e0] ss:$8 sps:$4 sm:$0xff]  }
  0x53   :  { %511 = vmatprep.subr.bf16.mxu0 %v2408_v52  ;;  %v2473_v52 = vld [vmem:[#allocation3 + $0x1f4] ss:$8 sps:$4 sm:$0xff]  }
  0x56   :  { %512 = vmatpush1.bf16.msra.mxu0 %v2410_v53  ;;  %v2471_v53 = vld [vmem:[#allocation3 + $0x1f0] ss:$8 sps:$4 sm:$0xff]  }
  0x57   :  { %513 = vmatprep.subr.bf16.mxu0 %v2411_v54  ;;  %v2474_v54 = vld [vmem:[#allocation3 + $0x200] ss:$8 sps:$4 sm:$0xff]  }
  0x5a   :  { %514 = vmatpush1.bf16.msra.mxu0 %v2413_v55  ;;  %v2476_v55 = vld [vmem:[#allocation3 + $0x204] ss:$8 sps:$4 sm:$0xff]  }
  0x5b   :  { %515 = vmatprep.subr.bf16.mxu0 %v2414_v56  ;;  %v2479_v56 = vld [vmem:[#allocation3 + $0x214] ss:$8 sps:$4 sm:$0xff]  }
  0x5e   :  { %516 = vmatpush1.bf16.msra.mxu0 %v2416_v57  ;;  %v2477_v57 = vld [vmem:[#allocation3 + $0x210] ss:$8 sps:$4 sm:$0xff]  }
  0x5f   :  { %517 = vmatprep.subr.bf16.mxu0 %v2417_v58  ;;  %v2482_v58 = vld [vmem:[#allocation3 + $0x224] ss:$8 sps:$4 sm:$0xff]  }
  0x62   :  { %518 = vmatpush1.bf16.msra.mxu0 %v2419_v59  ;;  %v2480_v59 = vld [vmem:[#allocation3 + $0x220] ss:$8 sps:$4 sm:$0xff]  }
  0x63   :  { %519 = vmatprep.subr.bf16.mxu0 %v2420_v60  ;;  %v2485_v60 = vld [vmem:[#allocation3 + $0x234] ss:$8 sps:$4 sm:$0xff]  }
  0x66   :  { %520 = vmatpush1.bf16.msra.mxu0 %v2422_v61  ;;  %v2483_v61 = vld [vmem:[#allocation3 + $0x230] ss:$8 sps:$4 sm:$0xff]  }
  0x67   :  { %521 = vmatprep.subr.bf16.mxu0 %v2423_v62  ;;  %v2488_v62 = vld [vmem:[#allocation3 + $0x244] ss:$8 sps:$4 sm:$0xff]  }
  0x6a   :  { %522 = vmatpush1.bf16.msra.mxu0 %v2425_v63  ;;  %v2486_v63 = vld [vmem:[#allocation3 + $0x240] ss:$8 sps:$4 sm:$0xff]  }
  0x6b   :  { %997 = vmatprep.subr.bf16.mxu0 %v2476_v55  ;;  %v2548_v55 = vld [vmem:[#allocation3 + $0x384] ss:$8 sps:$4 sm:$0xff]  }
  0xa9   :  { %v69_v23 = vpop.permute.xlu0 %68 }
  0xaa   :  { %vm70_vm0 = vcmp.eq.s32.totalorder %v69_v23, %v65_v24  ;;  %v2461_v23 = vld [vmem:[#allocation3 + $0x1b4] ss:$8 sps:$4 sm:$0xff]  }
  0xad   :  { %v75_v25 = vpop.permute.xlu0 %74 }
  0xae   :  { %vm76_vm1 = vcmp.eq.s32.totalorder %v75_v25, %v65_v24  ;;  %v2459_v24 = vld [vmem:[#allocation3 + $0x1b0] ss:$8 sps:$4 sm:$0xff]   ;;  %v2464_v25 = vld [vmem:[#allocation3 + $0x1c4] ss:$8 sps:$4 sm:$0xff]  }
  0xaf   :  { %vm77_vm2 = vmor %vm70_vm0, %vm76_vm1 }
  0xb0   :  { %v78_v27 = vsel %vm77_vm2, 1.0, %v2771_v26  ;;  %v2462_v26 = vld [vmem:[#allocation3 + $0x1c0] ss:$8 sps:$4 sm:$0xff]  }
  0xb1   :  { %v79_v29 = vpack.c.bf16 %v78_v27, %v78_v27  ;;  %v2467_v27 = vld [vmem:[#allocation3 + $0x1d4] ss:$8 sps:$4 sm:$0xff]  }
  0xb3   :  { %2099 = vmatmul.mubr.msk.bf16.vlgmr.msra.gmra.mrb[0].mxu1 %vm107_vm3, %v79_v29 }
  0xb4   :  { %229 = vmatpush1.bf16.msra.mxu1 %v2358_v28  ;;  %260 = vmatprep.mubr.bf16.mxu1 %v2770_v1  ;;  %v2428_v1 = vld [vmem:[#allocation3 + $0x104] ss:$8 sps:$4 sm:$0xff]   ;;  %v2465_v28 = vld [vmem:[#allocation3 + $0x1d0] ss:$8 sps:$4 sm:$0xff]  }
  0xb5   :  { %230 = vmatprep.subr.bf16.mxu1 %v2363_v30 }
  0xb8   :  { %231 = vmatpush1.bf16.msra.mxu1 %v2361_v31 }
  0xb9   :  { %232 = vmatprep.subr.bf16.mxu1 %v2366_v32 }
  0xbc   :  { %233 = vmatpush1.bf16.msra.mxu1 %v2364_v33  ;;  %v272_v33 = vshrl.u32 %v64_v22, 7 }
  0xbd   :  { %234 = vmatprep.subr.bf16.mxu1 %v2369_v34 }
  0xbe   :  { %v2910_v34 = vsub.s32 0, %v272_v33 }
  0xc0   :  { %235 = vmatpush1.bf16.msra.mxu1 %v2367_v35  ;;  %v2912_v35 = vsub.s32 1, %v272_v33 }
  0xc1   :  { %236 = vmatprep.subr.bf16.mxu1 %v2372_v36  ;;  %v269_v36 = vld [vmem:[%s3004_s5] sm:$0x3] }
  0xc2   :  { %v278_v39 = vrot.slane %v269_v36, %v2912_v35 }
  0xc4   :  { %237 = vmatpush1.bf16.msra.mxu1 %v2370_v37  ;;  %v274_v37 = vrot.slane %v269_v36, %v2910_v34  ;;  %v2518_v36 = vld [vmem:[#allocation3 + $0x2e4] ss:$8 sps:$4 sm:$0xff]  }
  0xc5   :  { %238 = vmatprep.subr.bf16.mxu1 %v2375_v38 }
  0xc8   :  { %239 = vmatpush1.bf16.msra.mxu1 %v2373_v40 }
  0xc9   :  { %2114 = vmatprep.subr.msk.bf16.mxu1 %vm221_vm4, %v2113_v41 }
  0xcc   :  { %241 = vmatpush1.bf16.msra.mxu1 %v223_v44 }
  0xcd   :  { %744 = vmatprep.subr.bf16.mxu1 %v2428_v1  ;;  %v2489_v1 = vld [vmem:[#allocation3 + $0x250] ss:$8 sps:$4 sm:$0xff]  }
  0xcf   :  { %2115 = vmatmul.mubr.msk.bf16.vlgmr.msra.gmra.mrb[4].mxu1 %vm217_vm5, %v81_v45 }
  0xd0   :  { %745 = vmatpush1.bf16.msra.mxu1 %v2426_v0  ;;  %v2491_v0 = vld [vmem:[#allocation3 + $0x254] ss:$8 sps:$4 sm:$0xff]  }
  0xd1   :  { %746 = vmatprep.subr.bf16.mxu1 %v2431_v2  ;;  %v2494_v2 = vld [vmem:[#allocation3 + $0x264] ss:$8 sps:$4 sm:$0xff]  }
  0xd4   :  { %747 = vmatpush1.bf16.msra.mxu1 %v2429_v3  ;;  %v2492_v3 = vld [vmem:[#allocation3 + $0x260] ss:$8 sps:$4 sm:$0xff]  }
  0xd5   :  { %748 = vmatprep.subr.bf16.mxu1 %v2434_v4  ;;  %v2497_v4 = vld [vmem:[#allocation3 + $0x274] ss:$8 sps:$4 sm:$0xff]  }
  0xd8   :  { %749 = vmatpush1.bf16.msra.mxu1 %v2432_v5  ;;  %v2495_v5 = vld [vmem:[#allocation3 + $0x270] ss:$8 sps:$4 sm:$0xff]  }
  0xd9   :  { %750 = vmatprep.subr.bf16.mxu1 %v2437_v6  ;;  %v2500_v6 = vld [vmem:[#allocation3 + $0x284] ss:$8 sps:$4 sm:$0xff]  }
  0xdc   :  { %751 = vmatpush1.bf16.msra.mxu1 %v2435_v7  ;;  %v2498_v7 = vld [vmem:[#allocation3 + $0x280] ss:$8 sps:$4 sm:$0xff]  }
  0xdd   :  { %752 = vmatprep.subr.bf16.mxu1 %v2440_v8  ;;  %v2503_v8 = vld [vmem:[#allocation3 + $0x294] ss:$8 sps:$4 sm:$0xff]  }
  0xe0   :  { %753 = vmatpush1.bf16.msra.mxu1 %v2438_v9  ;;  %v2501_v9 = vld [vmem:[#allocation3 + $0x290] ss:$8 sps:$4 sm:$0xff]  }
  0xe1   :  { %754 = vmatprep.subr.bf16.mxu1 %v2443_v10  ;;  %v2506_v10 = vld [vmem:[#allocation3 + $0x2a4] ss:$8 sps:$4 sm:$0xff]  }
  0xe4   :  { %755 = vmatpush1.bf16.msra.mxu1 %v2441_v11  ;;  %v2504_v11 = vld [vmem:[#allocation3 + $0x2a0] ss:$8 sps:$4 sm:$0xff]  }
  0xe5   :  { %756 = vmatprep.subr.bf16.mxu1 %v2446_v12  ;;  %v2509_v12 = vld [vmem:[#allocation3 + $0x2b4] ss:$8 sps:$4 sm:$0xff]  }
  0xe8   :  { %757 = vmatpush1.bf16.msra.mxu1 %v2444_v13  ;;  %v2507_v13 = vld [vmem:[#allocation3 + $0x2b0] ss:$8 sps:$4 sm:$0xff]  }
  0xe9   :  { %758 = vmatprep.subr.bf16.mxu1 %v2449_v14  ;;  %v2512_v14 = vld [vmem:[#allocation3 + $0x2c4] ss:$8 sps:$4 sm:$0xff]  }
  0xec   :  { %759 = vmatpush1.bf16.msra.mxu1 %v2447_v15  ;;  %v2510_v15 = vld [vmem:[#allocation3 + $0x2c0] ss:$8 sps:$4 sm:$0xff]  }
  0xed   :  { %760 = vmatprep.subr.bf16.mxu1 %v2452_v16  ;;  %v2515_v16 = vld [vmem:[#allocation3 + $0x2d4] ss:$8 sps:$4 sm:$0xff]  }
  0xf0   :  { %761 = vmatpush1.bf16.msra.mxu1 %v2450_v17  ;;  %v2513_v17 = vld [vmem:[#allocation3 + $0x2d0] ss:$8 sps:$4 sm:$0xff]  }
  0xf1   :  { %762 = vmatprep.subr.bf16.mxu1 %v2455_v18  ;;  %v319_v18 = vld [vmem:[%s3006_s7] sm:$0x3] }
  0xf4   :  { %763 = vmatpush1.bf16.msra.mxu1 %v2453_v19  ;;  %v324_v19 = vrot.slane %v319_v18, %v2910_v34 }
  0xf5   :  { %764 = vmatprep.subr.bf16.mxu1 %v2458_v20  ;;  %v328_v20 = vrot.slane %v319_v18, %v2912_v35  ;;  %v2566_v18 = vld [vmem:[#allocation3 + $0x3e4] ss:$8 sps:$4 sm:$0xff]  }
  0xf8   :  { %765 = vmatpush1.bf16.msra.mxu1 %v2456_v21 }
  0xf9   :  { %766 = vmatprep.subr.bf16.mxu1 %v2461_v23 }
  0xfc   :  { %767 = vmatpush1.bf16.msra.mxu1 %v2459_v24 }
  0xfd   :  { %768 = vmatprep.subr.bf16.mxu1 %v2464_v25 }
 0x100   :  { %769 = vmatpush1.bf16.msra.mxu1 %v2462_v26 }
 0x101   :  { %770 = vmatprep.subr.bf16.mxu1 %v2467_v27 }
 0x104   :  { %771 = vmatpush1.bf16.msra.mxu1 %v2465_v28 }
 0x105   :  { %772 = vmatprep.subr.bf16.mxu1 %v2470_v50  ;;  %v2537_v50 = vld [vmem:[#allocation3 + $0x350] ss:$8 sps:$4 sm:$0xff]  }
 0x108   :  { %773 = vmatpush1.bf16.msra.mxu1 %v2468_v51  ;;  %v2542_v51 = vld [vmem:[#allocation3 + $0x364] ss:$8 sps:$4 sm:$0xff]  }
 0x109   :  { %774 = vmatprep.subr.bf16.mxu1 %v2473_v52  ;;  %v2540_v52 = vld [vmem:[#allocation3 + $0x360] ss:$8 sps:$4 sm:$0xff]  }
 0x10c   :  { %775 = vmatpush1.bf16.msra.mxu1 %v2471_v53  ;;  %v2545_v53 = vld [vmem:[#allocation3 + $0x374] ss:$8 sps:$4 sm:$0xff]  }
 0x186   :  { %v145_v29 = vpop.f32.mrb[0].mxu1 }
 0x187   :  { %v147_v30 = vpop.f32.mrb[1].mxu1 }
 0x188   :  { %v149_v31 = vpop.f32.mrb[2].mxu1 }
 0x189   :  { %v150_v32 = vpop.f32.mrb[3].mxu1 }
 0x1a2   :  { %v262_v38 = vpop.f32.mrb[4].mxu1 }
 0x1a3   :  { %v263_v40 = vadd.f32 %v262_v38, %v145_v29  ;;  %v264_v41 = vpop.f32.mrb[5].mxu1  ;;  %v2521_v38 = vld [vmem:[#allocation3 + $0x2f4] ss:$8 sps:$4 sm:$0xff]  }
 0x1a4   :  { %v265_v42 = vadd.f32 %v264_v41, %v147_v30  ;;  %v266_v43 = vpop.f32.mrb[6].mxu1  ;;  %v2524_v41 = vld [vmem:[#allocation3 + $0x304] ss:$8 sps:$4 sm:$0xff]  }
 0x1a5   :  { %v281_v44 = vadd.f32 %v274_v37, %v263_v40  ;;  %v267_v45 = vpop.f32.mrb[7].mxu1  ;;  %v2516_v37 = vld [vmem:[#allocation3 + $0x2e0] ss:$8 sps:$4 sm:$0xff]   ;;  %1250 = vmatprep.subr.bf16.mxu1 %v2524_v41  ;;  %v2525_v43 = vld [vmem:[#allocation3 + $0x310] ss:$8 sps:$4 sm:$0xff]  }
 0x1a6   :  { %v282_v22 = vadd.f32 %v278_v39, %v265_v42  ;;  %v2519_v39 = vld [vmem:[#allocation3 + $0x2f0] ss:$8 sps:$4 sm:$0xff]   ;;  %v2522_v40 = vld [vmem:[#allocation3 + $0x300] ss:$8 sps:$4 sm:$0xff]   ;;  %v2527_v42 = vld [vmem:[#allocation3 + $0x314] ss:$8 sps:$4 sm:$0xff]  }
 0x1a7   :  { %v283_v46 = vmax.f32 %v281_v44, 0.0  ;;  %v2530_v44 = vld [vmem:[#allocation3 + $0x324] ss:$8 sps:$4 sm:$0xff]   ;;  %v2528_v45 = vld [vmem:[#allocation3 + $0x320] ss:$8 sps:$4 sm:$0xff]  }
 0x1a8   :  { %v284_v47 = vmax.f32 %v282_v22, 0.0  ;;  %v2533_v22 = vld [vmem:[#allocation3 + $0x334] ss:$8 sps:$4 sm:$0xff]   ;;  %v2596_v41 = vld [vmem:[#allocation3 + $0x484] ss:$8 sps:$4 sm:$0xff]  }
 0x1a9   :  { %v2921_v49 = vpack.c.bf16 %v283_v46, %v283_v46  ;;  %v2531_v46 = vld [vmem:[#allocation3 + $0x330] ss:$8 sps:$4 sm:$0xff]  }
 0x1aa   :  { %v2919_v48 = vpack.c.bf16 %v284_v47, %v284_v47  ;;  %v2536_v47 = vld [vmem:[#allocation3 + $0x344] ss:$8 sps:$4 sm:$0xff]  }
 0x1ac   :  { %523 = vmatprep.mubr.bf16.mxu0 %v2919_v48 }
 0x1ad   :  { %524 = vmatmul.mubr.bf16.vlgmr.msra.gmra.mrb[0].mxu0 %v2921_v49 }
 0x1ae   :  { %998 = vmatpush1.bf16.msra.mxu0 %v2474_v54  ;;  %v2543_v54 = vld [vmem:[#allocation3 + $0x370] ss:$8 sps:$4 sm:$0xff]  }
 0x1af   :  { %999 = vmatprep.subr.bf16.mxu0 %v2479_v56  ;;  %v2546_v56 = vld [vmem:[#allocation3 + $0x380] ss:$8 sps:$4 sm:$0xff]  }
 0x1b2   :  { %1000 = vmatpush1.bf16.msra.mxu0 %v2477_v57  ;;  %v2551_v57 = vld [vmem:[#allocation3 + $0x394] ss:$8 sps:$4 sm:$0xff]  }
 0x1b3   :  { %1001 = vmatprep.subr.bf16.mxu0 %v2482_v58  ;;  %v2549_v58 = vld [vmem:[#allocation3 + $0x390] ss:$8 sps:$4 sm:$0xff]  }
 0x1b6   :  { %1002 = vmatpush1.bf16.msra.mxu0 %v2480_v59  ;;  %v2554_v59 = vld [vmem:[#allocation3 + $0x3a4] ss:$8 sps:$4 sm:$0xff]  }
 0x1b7   :  { %1003 = vmatprep.subr.bf16.mxu0 %v2485_v60  ;;  %v2552_v60 = vld [vmem:[#allocation3 + $0x3a0] ss:$8 sps:$4 sm:$0xff]  }
 0x1ba   :  { %1004 = vmatpush1.bf16.msra.mxu0 %v2483_v61  ;;  %v2557_v61 = vld [vmem:[#allocation3 + $0x3b4] ss:$8 sps:$4 sm:$0xff]  }
 0x1bb   :  { %1005 = vmatprep.subr.bf16.mxu0 %v2488_v62  ;;  %v2555_v62 = vld [vmem:[#allocation3 + $0x3b0] ss:$8 sps:$4 sm:$0xff]  }
 0x1be   :  { %1006 = vmatpush1.bf16.msra.mxu0 %v2486_v63  ;;  %v2560_v63 = vld [vmem:[#allocation3 + $0x3c4] ss:$8 sps:$4 sm:$0xff]  }
 0x1bf   :  { %1007 = vmatprep.subr.bf16.mxu0 %v2491_v0  ;;  %v2558_v0 = vld [vmem:[#allocation3 + $0x3c0] ss:$8 sps:$4 sm:$0xff]  }
 0x1c2   :  { %1008 = vmatpush1.bf16.msra.mxu0 %v2489_v1  ;;  %v2563_v1 = vld [vmem:[#allocation3 + $0x3d4] ss:$8 sps:$4 sm:$0xff]  }
 0x1c3   :  { %1009 = vmatprep.subr.bf16.mxu0 %v2494_v2  ;;  %v2561_v2 = vld [vmem:[#allocation3 + $0x3d0] ss:$8 sps:$4 sm:$0xff]  }
 0x1c6   :  { %1010 = vmatpush1.bf16.msra.mxu0 %v2492_v3  ;;  %v2148_v3 = vld [vmem:[%s3006_s7 + $0x2] sm:$0x3] }
 0x1c7   :  { %1011 = vmatprep.subr.bf16.mxu0 %v2497_v4  ;;  %v577_v4 = vrot.slane %v2148_v3, %v2910_v34 }
 0x1ca   :  { %1012 = vmatpush1.bf16.msra.mxu0 %v2495_v5  ;;  %v581_v5 = vrot.slane %v2148_v3, %v2912_v35  ;;  %v2614_v3 = vld [vmem:[#allocation3 + $0x4e4] ss:$8 sps:$4 sm:$0xff]  }
 0x1cb   :  { %1013 = vmatprep.subr.bf16.mxu0 %v2500_v6 }
 0x1ce   :  { %1014 = vmatpush1.bf16.msra.mxu0 %v2498_v7 }
 0x1cf   :  { %1015 = vmatprep.subr.bf16.mxu0 %v2503_v8 }
 0x1d2   :  { %1016 = vmatpush1.bf16.msra.mxu0 %v2501_v9 }
 0x1d3   :  { %1017 = vmatprep.subr.bf16.mxu0 %v2506_v10 }
 0x1d6   :  { %1018 = vmatpush1.bf16.msra.mxu0 %v2504_v11 }
 0x1d7   :  { %1019 = vmatprep.subr.bf16.mxu0 %v2509_v12 }
 0x1da   :  { %1020 = vmatpush1.bf16.msra.mxu0 %v2507_v13 }
 0x1db   :  { %1021 = vmatprep.subr.bf16.mxu0 %v2512_v14 }
 0x1de   :  { %1022 = vmatpush1.bf16.msra.mxu0 %v2510_v15 }
 0x1df   :  { %1023 = vmatprep.subr.bf16.mxu0 %v2515_v16 }
 0x1e2   :  { %1024 = vmatpush1.bf16.msra.mxu0 %v2513_v17 }
 0x1e3   :  { %1025 = vmatprep.subr.bf16.mxu0 %v2518_v36  ;;  %v2585_v36 = vld [vmem:[#allocation3 + $0x450] ss:$8 sps:$4 sm:$0xff]  }
 0x1e6   :  { %1026 = vmatpush1.bf16.msra.mxu0 %v2516_v37  ;;  %v2590_v37 = vld [vmem:[#allocation3 + $0x464] ss:$8 sps:$4 sm:$0xff]  }
 0x1e7   :  { %1027 = vmatprep.subr.bf16.mxu0 %v2521_v38  ;;  %v2588_v38 = vld [vmem:[#allocation3 + $0x460] ss:$8 sps:$4 sm:$0xff]  }
 0x1ea   :  { %1028 = vmatpush1.bf16.msra.mxu0 %v2519_v39  ;;  %v2593_v39 = vld [vmem:[#allocation3 + $0x474] ss:$8 sps:$4 sm:$0xff]  }
 0x280   :  { %v525_v21 = vpop.f32.mrb[0].mxu0 }
 0x281   :  { %v526_v23 = vadd.f32 %v525_v21, %v324_v19  ;;  %v527_v24 = vpop.f32.mrb[1].mxu0  ;;  %v2564_v19 = vld [vmem:[#allocation3 + $0x3e0] ss:$8 sps:$4 sm:$0xff]   ;;  %v2567_v21 = vld [vmem:[#allocation3 + $0x3f0] ss:$8 sps:$4 sm:$0xff]  }
 0x282   :  { %v528_v25 = vadd.f32 %v527_v24, %v328_v20  ;;  %v529_v26 = vpop.f32.mrb[2].mxu0  ;;  %v2569_v20 = vld [vmem:[#allocation3 + $0x3f4] ss:$8 sps:$4 sm:$0xff]   ;;  %v2572_v24 = vld [vmem:[#allocation3 + $0x404] ss:$8 sps:$4 sm:$0xff]  }
 0x283   :  { %v532_v27 = vmax.f32 %v526_v23, 0.0  ;;  %v530_v28 = vpop.f32.mrb[3].mxu0  ;;  %v2570_v23 = vld [vmem:[#allocation3 + $0x400] ss:$8 sps:$4 sm:$0xff]   ;;  %1503 = vmatprep.subr.bf16.mxu0 %v2572_v24  ;;  %v2573_v26 = vld [vmem:[#allocation3 + $0x410] ss:$8 sps:$4 sm:$0xff]  }
 0x284   :  { %v533_v29 = vmax.f32 %v528_v25, 0.0  ;;  %v2575_v25 = vld [vmem:[#allocation3 + $0x414] ss:$8 sps:$4 sm:$0xff]   ;;  %v2576_v28 = vld [vmem:[#allocation3 + $0x420] ss:$8 sps:$4 sm:$0xff]  }
 0x285   :  { %v534_v30 = vpack.c.bf16 %v532_v27, %v532_v27  ;;  %v2578_v27 = vld [vmem:[#allocation3 + $0x424] ss:$8 sps:$4 sm:$0xff]  }
 0x286   :  { %v535_v31 = vpack.c.bf16 %v533_v29, %v533_v29  ;;  %v2581_v29 = vld [vmem:[#allocation3 + $0x434] ss:$8 sps:$4 sm:$0xff]   ;;  %v2644_v24 = vld [vmem:[#allocation3 + $0x584] ss:$8 sps:$4 sm:$0xff]  }
 0x287   :  { %v2934_v33 = vadd.bf16 %v534_v30, %v2921_v49  ;;  %v2539_v49 = vld [vmem:[#allocation3 + $0x354] ss:$8 sps:$4 sm:$0xff]   ;;  %v2579_v30 = vld [vmem:[#allocation3 + $0x430] ss:$8 sps:$4 sm:$0xff]  }
 0x288   :  { %v2931_v32 = vadd.bf16 %v535_v31, %v2919_v48  ;;  %v2534_v48 = vld [vmem:[#allocation3 + $0x340] ss:$8 sps:$4 sm:$0xff]   ;;  %v2584_v31 = vld [vmem:[#allocation3 + $0x444] ss:$8 sps:$4 sm:$0xff]  }
 0x28a   :  { %776 = vmatprep.mubr.bf16.mxu1 %v2931_v32 }
 0x28b   :  { %777 = vmatmul.mubr.bf16.vlgmr.msra.gmra.mrb[8].mxu1 %v2934_v33 }
 0x28c   :  { %1251 = vmatpush1.bf16.msra.mxu1 %v2522_v40  ;;  %v2591_v40 = vld [vmem:[#allocation3 + $0x470] ss:$8 sps:$4 sm:$0xff]  }
 0x28d   :  { %1252 = vmatprep.subr.bf16.mxu1 %v2527_v42  ;;  %v2594_v42 = vld [vmem:[#allocation3 + $0x480] ss:$8 sps:$4 sm:$0xff]  }
 0x290   :  { %1253 = vmatpush1.bf16.msra.mxu1 %v2525_v43  ;;  %v2599_v43 = vld [vmem:[#allocation3 + $0x494] ss:$8 sps:$4 sm:$0xff]  }
 0x291   :  { %1254 = vmatprep.subr.bf16.mxu1 %v2530_v44  ;;  %v2597_v44 = vld [vmem:[#allocation3 + $0x490] ss:$8 sps:$4 sm:$0xff]  }
 0x294   :  { %1255 = vmatpush1.bf16.msra.mxu1 %v2528_v45  ;;  %v2602_v45 = vld [vmem:[#allocation3 + $0x4a4] ss:$8 sps:$4 sm:$0xff]  }
 0x295   :  { %1256 = vmatprep.subr.bf16.mxu1 %v2533_v22  ;;  %v2600_v22 = vld [vmem:[#allocation3 + $0x4a0] ss:$8 sps:$4 sm:$0xff]  }
 0x298   :  { %1257 = vmatpush1.bf16.msra.mxu1 %v2531_v46  ;;  %v2605_v46 = vld [vmem:[#allocation3 + $0x4b4] ss:$8 sps:$4 sm:$0xff]  }
 0x299   :  { %1258 = vmatprep.subr.bf16.mxu1 %v2536_v47  ;;  %v2603_v47 = vld [vmem:[#allocation3 + $0x4b0] ss:$8 sps:$4 sm:$0xff]  }
 0x29c   :  { %1259 = vmatpush1.bf16.msra.mxu1 %v2534_v48  ;;  %v2608_v48 = vld [vmem:[#allocation3 + $0x4c4] ss:$8 sps:$4 sm:$0xff]  }
 0x29d   :  { %1260 = vmatprep.subr.bf16.mxu1 %v2539_v49  ;;  %v2606_v49 = vld [vmem:[#allocation3 + $0x4c0] ss:$8 sps:$4 sm:$0xff]  }
 0x2a0   :  { %1261 = vmatpush1.bf16.msra.mxu1 %v2537_v50  ;;  %v2611_v50 = vld [vmem:[#allocation3 + $0x4d4] ss:$8 sps:$4 sm:$0xff]  }
 0x2a1   :  { %1262 = vmatprep.subr.bf16.mxu1 %v2542_v51  ;;  %v2609_v51 = vld [vmem:[#allocation3 + $0x4d0] ss:$8 sps:$4 sm:$0xff]  }
 0x2a4   :  { %1263 = vmatpush1.bf16.msra.mxu1 %v2540_v52  ;;  %v2181_v52 = vld [vmem:[%s3006_s7 + $0x4] sm:$0x3] }
 0x2a5   :  { %1264 = vmatprep.subr.bf16.mxu1 %v2545_v53  ;;  %v830_v53 = vrot.slane %v2181_v52, %v2910_v34 }
 0x2a8   :  { %1265 = vmatpush1.bf16.msra.mxu1 %v2543_v54  ;;  %v834_v54 = vrot.slane %v2181_v52, %v2912_v35  ;;  %v2662_v52 = vld [vmem:[#allocation3 + $0x5e4] ss:$8 sps:$4 sm:$0xff]  }
 0x2a9   :  { %1266 = vmatprep.subr.bf16.mxu1 %v2548_v55 }
 0x2ac   :  { %1267 = vmatpush1.bf16.msra.mxu1 %v2546_v56 }
 0x2ad   :  { %1268 = vmatprep.subr.bf16.mxu1 %v2551_v57 }
 0x2b0   :  { %1269 = vmatpush1.bf16.msra.mxu1 %v2549_v58 }
 0x2b1   :  { %1270 = vmatprep.subr.bf16.mxu1 %v2554_v59 }
 0x2b4   :  { %1271 = vmatpush1.bf16.msra.mxu1 %v2552_v60 }
 0x2b5   :  { %1272 = vmatprep.subr.bf16.mxu1 %v2557_v61 }
 0x2b8   :  { %1273 = vmatpush1.bf16.msra.mxu1 %v2555_v62 }
 0x2b9   :  { %1274 = vmatprep.subr.bf16.mxu1 %v2560_v63 }
 0x2bc   :  { %1275 = vmatpush1.bf16.msra.mxu1 %v2558_v0 }
 0x2bd   :  { %1276 = vmatprep.subr.bf16.mxu1 %v2563_v1 }
 0x2c0   :  { %1277 = vmatpush1.bf16.msra.mxu1 %v2561_v2 }
 0x2c1   :  { %1278 = vmatprep.subr.bf16.mxu1 %v2566_v18  ;;  %v2633_v18 = vld [vmem:[#allocation3 + $0x550] ss:$8 sps:$4 sm:$0xff]  }
 0x2c4   :  { %1279 = vmatpush1.bf16.msra.mxu1 %v2564_v19  ;;  %v2638_v19 = vld [vmem:[#allocation3 + $0x564] ss:$8 sps:$4 sm:$0xff]  }
 0x2c5   :  { %1280 = vmatprep.subr.bf16.mxu1 %v2569_v20  ;;  %v2636_v20 = vld [vmem:[#allocation3 + $0x560] ss:$8 sps:$4 sm:$0xff]  }
 0x2c8   :  { %1281 = vmatpush1.bf16.msra.mxu1 %v2567_v21  ;;  %v2641_v21 = vld [vmem:[#allocation3 + $0x574] ss:$8 sps:$4 sm:$0xff]  }
 0x35e   :  { %v778_v6 = vpop.f32.mrb[8].mxu1 }
 0x35f   :  { %v779_v7 = vadd.f32 %v778_v6, %v577_v4  ;;  %v780_v8 = vpop.f32.mrb[9].mxu1  ;;  %v2612_v4 = vld [vmem:[#allocation3 + $0x4e0] ss:$8 sps:$4 sm:$0xff]   ;;  %v2615_v6 = vld [vmem:[#allocation3 + $0x4f0] ss:$8 sps:$4 sm:$0xff]  }
 0x360   :  { %v781_v9 = vadd.f32 %v780_v8, %v581_v5  ;;  %v782_v10 = vpop.f32.mrb[10].mxu1  ;;  %v2617_v5 = vld [vmem:[#allocation3 + $0x4f4] ss:$8 sps:$4 sm:$0xff]   ;;  %v2620_v8 = vld [vmem:[#allocation3 + $0x504] ss:$8 sps:$4 sm:$0xff]  }
 0x361   :  { %v785_v11 = vmax.f32 %v779_v7, 0.0  ;;  %v783_v12 = vpop.f32.mrb[11].mxu1  ;;  %v2618_v7 = vld [vmem:[#allocation3 + $0x500] ss:$8 sps:$4 sm:$0xff]   ;;  %1756 = vmatprep.subr.bf16.mxu1 %v2620_v8  ;;  %v2621_v10 = vld [vmem:[#allocation3 + $0x510] ss:$8 sps:$4 sm:$0xff]  }
 0x362   :  { %v786_v13 = vmax.f32 %v781_v9, 0.0  ;;  %v2623_v9 = vld [vmem:[#allocation3 + $0x514] ss:$8 sps:$4 sm:$0xff]   ;;  %v2624_v12 = vld [vmem:[#allocation3 + $0x520] ss:$8 sps:$4 sm:$0xff]  }
 0x363   :  { %v787_v14 = vpack.c.bf16 %v785_v11, %v785_v11  ;;  %v2626_v11 = vld [vmem:[#allocation3 + $0x524] ss:$8 sps:$4 sm:$0xff]  }
 0x364   :  { %v788_v15 = vpack.c.bf16 %v786_v13, %v786_v13  ;;  %v2629_v13 = vld [vmem:[#allocation3 + $0x534] ss:$8 sps:$4 sm:$0xff]   ;;  %v2692_v8 = vld [vmem:[#allocation3 + $0x684] ss:$8 sps:$4 sm:$0xff]  }
 0x365   :  { %v2947_v17 = vadd.bf16 %v787_v14, %v2934_v33  ;;  %v2587_v33 = vld [vmem:[#allocation3 + $0x454] ss:$8 sps:$4 sm:$0xff]   ;;  %v2627_v14 = vld [vmem:[#allocation3 + $0x530] ss:$8 sps:$4 sm:$0xff]  }
 0x366   :  { %v2944_v16 = vadd.bf16 %v788_v15, %v2931_v32  ;;  %v2582_v32 = vld [vmem:[#allocation3 + $0x440] ss:$8 sps:$4 sm:$0xff]   ;;  %v2632_v15 = vld [vmem:[#allocation3 + $0x544] ss:$8 sps:$4 sm:$0xff]  }
 0x368   :  { %1029 = vmatprep.mubr.bf16.mxu0 %v2944_v16 }
 0x369   :  { %1030 = vmatmul.mubr.bf16.vlgmr.msra.gmra.mrb[4].mxu0 %v2947_v17 }
 0x36a   :  { %1504 = vmatpush1.bf16.msra.mxu0 %v2570_v23  ;;  %v2639_v23 = vld [vmem:[#allocation3 + $0x570] ss:$8 sps:$4 sm:$0xff]  }
 0x36b   :  { %1505 = vmatprep.subr.bf16.mxu0 %v2575_v25  ;;  %v2642_v25 = vld [vmem:[#allocation3 + $0x580] ss:$8 sps:$4 sm:$0xff]  }
 0x36e   :  { %1506 = vmatpush1.bf16.msra.mxu0 %v2573_v26  ;;  %v2647_v26 = vld [vmem:[#allocation3 + $0x594] ss:$8 sps:$4 sm:$0xff]  }
 0x36f   :  { %1507 = vmatprep.subr.bf16.mxu0 %v2578_v27  ;;  %v2645_v27 = vld [vmem:[#allocation3 + $0x590] ss:$8 sps:$4 sm:$0xff]  }
 0x372   :  { %1508 = vmatpush1.bf16.msra.mxu0 %v2576_v28  ;;  %v2650_v28 = vld [vmem:[#allocation3 + $0x5a4] ss:$8 sps:$4 sm:$0xff]  }
 0x373   :  { %1509 = vmatprep.subr.bf16.mxu0 %v2581_v29  ;;  %v2648_v29 = vld [vmem:[#allocation3 + $0x5a0] ss:$8 sps:$4 sm:$0xff]  }
 0x376   :  { %1510 = vmatpush1.bf16.msra.mxu0 %v2579_v30  ;;  %v2653_v30 = vld [vmem:[#allocation3 + $0x5b4] ss:$8 sps:$4 sm:$0xff]  }
 0x377   :  { %1511 = vmatprep.subr.bf16.mxu0 %v2584_v31  ;;  %v2651_v31 = vld [vmem:[#allocation3 + $0x5b0] ss:$8 sps:$4 sm:$0xff]  }
 0x37a   :  { %1512 = vmatpush1.bf16.msra.mxu0 %v2582_v32  ;;  %v2656_v32 = vld [vmem:[#allocation3 + $0x5c4] ss:$8 sps:$4 sm:$0xff]  }
 0x37b   :  { %1513 = vmatprep.subr.bf16.mxu0 %v2587_v33  ;;  %v2654_v33 = vld [vmem:[#allocation3 + $0x5c0] ss:$8 sps:$4 sm:$0xff]  }
 0x37e   :  { %1514 = vmatpush1.bf16.msra.mxu0 %v2585_v36  ;;  %v2659_v36 = vld [vmem:[#allocation3 + $0x5d4] ss:$8 sps:$4 sm:$0xff]  }
 0x37f   :  { %1515 = vmatprep.subr.bf16.mxu0 %v2590_v37  ;;  %v2657_v37 = vld [vmem:[#allocation3 + $0x5d0] ss:$8 sps:$4 sm:$0xff]  }
 0x382   :  { %1516 = vmatpush1.bf16.msra.mxu0 %v2588_v38  ;;  %v2214_v38 = vld [vmem:[%s3006_s7 + $0x6] sm:$0x3] }
 0x383   :  { %1517 = vmatprep.subr.bf16.mxu0 %v2593_v39  ;;  %v1083_v39 = vrot.slane %v2214_v38, %v2910_v34 }
 0x386   :  { %1518 = vmatpush1.bf16.msra.mxu0 %v2591_v40  ;;  %v1087_v40 = vrot.slane %v2214_v38, %v2912_v35  ;;  %v2710_v38 = vld [vmem:[#allocation3 + $0x6e4] ss:$8 sps:$4 sm:$0xff]  }
 0x387   :  { %1519 = vmatprep.subr.bf16.mxu0 %v2596_v41 }
 0x38a   :  { %1520 = vmatpush1.bf16.msra.mxu0 %v2594_v42 }
 0x38b   :  { %1521 = vmatprep.subr.bf16.mxu0 %v2599_v43 }
 0x38e   :  { %1522 = vmatpush1.bf16.msra.mxu0 %v2597_v44 }
 0x38f   :  { %1523 = vmatprep.subr.bf16.mxu0 %v2602_v45 }
 0x392   :  { %1524 = vmatpush1.bf16.msra.mxu0 %v2600_v22 }
 0x393   :  { %1525 = vmatprep.subr.bf16.mxu0 %v2605_v46 }
 0x396   :  { %1526 = vmatpush1.bf16.msra.mxu0 %v2603_v47 }
 0x397   :  { %1527 = vmatprep.subr.bf16.mxu0 %v2608_v48 }
 0x39a   :  { %1528 = vmatpush1.bf16.msra.mxu0 %v2606_v49 }
 0x39b   :  { %1529 = vmatprep.subr.bf16.mxu0 %v2611_v50 }
 0x39e   :  { %1530 = vmatpush1.bf16.msra.mxu0 %v2609_v51 }
 0x39f   :  { %1531 = vmatprep.subr.bf16.mxu0 %v2614_v3  ;;  %v2681_v3 = vld [vmem:[#allocation3 + $0x650] ss:$8 sps:$4 sm:$0xff]  }
 0x3a2   :  { %1532 = vmatpush1.bf16.msra.mxu0 %v2612_v4  ;;  %v2686_v4 = vld [vmem:[#allocation3 + $0x664] ss:$8 sps:$4 sm:$0xff]  }
 0x3a3   :  { %1533 = vmatprep.subr.bf16.mxu0 %v2617_v5  ;;  %v2684_v5 = vld [vmem:[#allocation3 + $0x660] ss:$8 sps:$4 sm:$0xff]  }
 0x3a6   :  { %1534 = vmatpush1.bf16.msra.mxu0 %v2615_v6  ;;  %v2689_v6 = vld [vmem:[#allocation3 + $0x674] ss:$8 sps:$4 sm:$0xff]  }
 0x43c   :  { %v1031_v55 = vpop.f32.mrb[4].mxu0 }
 0x43d   :  { %v1032_v56 = vadd.f32 %v1031_v55, %v830_v53  ;;  %v1033_v57 = vpop.f32.mrb[5].mxu0  ;;  %v2660_v53 = vld [vmem:[#allocation3 + $0x5e0] ss:$8 sps:$4 sm:$0xff]   ;;  %v2663_v55 = vld [vmem:[#allocation3 + $0x5f0] ss:$8 sps:$4 sm:$0xff]  }
 0x43e   :  { %v1034_v58 = vadd.f32 %v1033_v57, %v834_v54  ;;  %v1035_v59 = vpop.f32.mrb[6].mxu0  ;;  %v2665_v54 = vld [vmem:[#allocation3 + $0x5f4] ss:$8 sps:$4 sm:$0xff]   ;;  %v2668_v57 = vld [vmem:[#allocation3 + $0x604] ss:$8 sps:$4 sm:$0xff]  }
 0x43f   :  { %v1038_v60 = vmax.f32 %v1032_v56, 0.0  ;;  %v1036_v61 = vpop.f32.mrb[7].mxu0  ;;  %v2666_v56 = vld [vmem:[#allocation3 + $0x600] ss:$8 sps:$4 sm:$0xff]   ;;  %2009 = vmatprep.subr.bf16.mxu0 %v2668_v57  ;;  %v2669_v59 = vld [vmem:[#allocation3 + $0x610] ss:$8 sps:$4 sm:$0xff]  }
 0x440   :  { %v1039_v62 = vmax.f32 %v1034_v58, 0.0  ;;  %v2671_v58 = vld [vmem:[#allocation3 + $0x614] ss:$8 sps:$4 sm:$0xff]   ;;  %v2672_v61 = vld [vmem:[#allocation3 + $0x620] ss:$8 sps:$4 sm:$0xff]  }
 0x441   :  { %v1040_v63 = vpack.c.bf16 %v1038_v60, %v1038_v60  ;;  %v2674_v60 = vld [vmem:[#allocation3 + $0x624] ss:$8 sps:$4 sm:$0xff]  }
 0x442   :  { %v1041_v0 = vpack.c.bf16 %v1039_v62, %v1039_v62  ;;  %v2677_v62 = vld [vmem:[#allocation3 + $0x634] ss:$8 sps:$4 sm:$0xff]  }
 0x443   :  { %v2960_v2 = vadd.bf16 %v1040_v63, %v2947_v17  ;;  %v2635_v17 = vld [vmem:[#allocation3 + $0x554] ss:$8 sps:$4 sm:$0xff]   ;;  %v2675_v63 = vld [vmem:[#allocation3 + $0x630] ss:$8 sps:$4 sm:$0xff]  }
 0x444   :  { %v2957_v1 = vadd.bf16 %v1041_v0, %v2944_v16  ;;  %v2630_v16 = vld [vmem:[#allocation3 + $0x540] ss:$8 sps:$4 sm:$0xff]   ;;  %v2680_v0 = vld [vmem:[#allocation3 + $0x644] ss:$8 sps:$4 sm:$0xff]  }
 0x446   :  { %1282 = vmatprep.mubr.bf16.mxu1 %v2957_v1 }
 0x447   :  { %1283 = vmatmul.mubr.bf16.vlgmr.msra.gmra.mrb[12].mxu1 %v2960_v2 }
 0x448   :  { %1757 = vmatpush1.bf16.msra.mxu1 %v2618_v7  ;;  %v2687_v7 = vld [vmem:[#allocation3 + $0x670] ss:$8 sps:$4 sm:$0xff]  }
 0x449   :  { %1758 = vmatprep.subr.bf16.mxu1 %v2623_v9  ;;  %v2690_v9 = vld [vmem:[#allocation3 + $0x680] ss:$8 sps:$4 sm:$0xff]  }
 0x44c   :  { %1759 = vmatpush1.bf16.msra.mxu1 %v2621_v10  ;;  %v2695_v10 = vld [vmem:[#allocation3 + $0x694] ss:$8 sps:$4 sm:$0xff]  }
 0x44d   :  { %1760 = vmatprep.subr.bf16.mxu1 %v2626_v11  ;;  %v2693_v11 = vld [vmem:[#allocation3 + $0x690] ss:$8 sps:$4 sm:$0xff]  }
 0x450   :  { %1761 = vmatpush1.bf16.msra.mxu1 %v2624_v12  ;;  %v2698_v12 = vld [vmem:[#allocation3 + $0x6a4] ss:$8 sps:$4 sm:$0xff]  }
 0x451   :  { %1762 = vmatprep.subr.bf16.mxu1 %v2629_v13  ;;  %v2696_v13 = vld [vmem:[#allocation3 + $0x6a0] ss:$8 sps:$4 sm:$0xff]  }
 0x454   :  { %1763 = vmatpush1.bf16.msra.mxu1 %v2627_v14  ;;  %v2701_v14 = vld [vmem:[#allocation3 + $0x6b4] ss:$8 sps:$4 sm:$0xff]  }
 0x455   :  { %1764 = vmatprep.subr.bf16.mxu1 %v2632_v15  ;;  %v2699_v15 = vld [vmem:[#allocation3 + $0x6b0] ss:$8 sps:$4 sm:$0xff]  }
 0x458   :  { %1765 = vmatpush1.bf16.msra.mxu1 %v2630_v16  ;;  %v2704_v16 = vld [vmem:[#allocation3 + $0x6c4] ss:$8 sps:$4 sm:$0xff]  }
 0x459   :  { %1766 = vmatprep.subr.bf16.mxu1 %v2635_v17  ;;  %v2702_v17 = vld [vmem:[#allocation3 + $0x6c0] ss:$8 sps:$4 sm:$0xff]  }
 0x45c   :  { %1767 = vmatpush1.bf16.msra.mxu1 %v2633_v18  ;;  %v2707_v18 = vld [vmem:[#allocation3 + $0x6d4] ss:$8 sps:$4 sm:$0xff]  }
 0x45d   :  { %1768 = vmatprep.subr.bf16.mxu1 %v2638_v19  ;;  %v2705_v19 = vld [vmem:[#allocation3 + $0x6d0] ss:$8 sps:$4 sm:$0xff]  }
 0x460   :  { %1769 = vmatpush1.bf16.msra.mxu1 %v2636_v20  ;;  %v2247_v20 = vld [vmem:[%s3006_s7 + $0x8] sm:$0x3] }
 0x461   :  { %1770 = vmatprep.subr.bf16.mxu1 %v2641_v21  ;;  %v1336_v21 = vrot.slane %v2247_v20, %v2910_v34 }
 0x464   :  { %1771 = vmatpush1.bf16.msra.mxu1 %v2639_v23  ;;  %v1340_v23 = vrot.slane %v2247_v20, %v2912_v35 }
 0x465   :  { %1772 = vmatprep.subr.bf16.mxu1 %v2644_v24 }
 0x468   :  { %1773 = vmatpush1.bf16.msra.mxu1 %v2642_v25 }
 0x469   :  { %1774 = vmatprep.subr.bf16.mxu1 %v2647_v26 }
 0x46c   :  { %1775 = vmatpush1.bf16.msra.mxu1 %v2645_v27 }
 0x46d   :  { %1776 = vmatprep.subr.bf16.mxu1 %v2650_v28 }
 0x470   :  { %1777 = vmatpush1.bf16.msra.mxu1 %v2648_v29 }
 0x471   :  { %1778 = vmatprep.subr.bf16.mxu1 %v2653_v30 }
 0x474   :  { %1779 = vmatpush1.bf16.msra.mxu1 %v2651_v31 }
 0x475   :  { %1780 = vmatprep.subr.bf16.mxu1 %v2656_v32 }
 0x478   :  { %1781 = vmatpush1.bf16.msra.mxu1 %v2654_v33 }
 0x479   :  { %1782 = vmatprep.subr.bf16.mxu1 %v2659_v36 }
 0x47c   :  { %1783 = vmatpush1.bf16.msra.mxu1 %v2657_v37 }
 0x47d   :  { %1784 = vmatprep.subr.bf16.mxu1 %v2662_v52 }
 0x480   :  { %1785 = vmatpush1.bf16.msra.mxu1 %v2660_v53 }
 0x481   :  { %1786 = vmatprep.subr.bf16.mxu1 %v2665_v54 }
 0x484   :  { %1787 = vmatpush1.bf16.msra.mxu1 %v2663_v55 }
 0x51a   :  { %v1284_v41 = vpop.f32.mrb[12].mxu1 }
 0x51b   :  { %v1285_v42 = vadd.f32 %v1284_v41, %v1083_v39  ;;  %v1286_v43 = vpop.f32.mrb[13].mxu1  ;;  %v2708_v39 = vld [vmem:[#allocation3 + $0x6e0] ss:$8 sps:$4 sm:$0xff]   ;;  %v2711_v41 = vld [vmem:[#allocation3 + $0x6f0] ss:$8 sps:$4 sm:$0xff]  }
 0x51c   :  { %v1287_v44 = vadd.f32 %v1286_v43, %v1087_v40  ;;  %v1288_v45 = vpop.f32.mrb[14].mxu1  ;;  %v2713_v40 = vld [vmem:[#allocation3 + $0x6f4] ss:$8 sps:$4 sm:$0xff]  }
 0x51d   :  { %v1291_v22 = vmax.f32 %v1285_v42, 0.0  ;;  %v1289_v46 = vpop.f32.mrb[15].mxu1  ;;  %v2280_v42 = vld [vmem:[%s3006_s7 + $0xa] sm:$0x3] }
 0x51e   :  { %v1292_v47 = vmax.f32 %v1287_v44, 0.0  ;;  %v1589_v43 = vrot.slane %v2280_v42, %v2910_v34  ;;  %v1593_v44 = vrot.slane %v2280_v42, %v2912_v35 }
 0x51f   :  { %v1293_v48 = vpack.c.bf16 %v1291_v22, %v1291_v22 }
 0x520   :  { %v1294_v49 = vpack.c.bf16 %v1292_v47, %v1292_v47 }
 0x521   :  { %v2973_v51 = vadd.bf16 %v1293_v48, %v2960_v2  ;;  %v2683_v2 = vld [vmem:[#allocation3 + $0x654] ss:$8 sps:$4 sm:$0xff]  }
 0x522   :  { %v2970_v50 = vadd.bf16 %v1294_v49, %v2957_v1  ;;  %v2678_v1 = vld [vmem:[#allocation3 + $0x640] ss:$8 sps:$4 sm:$0xff]  }
 0x524   :  { %1535 = vmatprep.mubr.bf16.mxu0 %v2970_v50 }
 0x525   :  { %1536 = vmatmul.mubr.bf16.vlgmr.msra.gmra.mrb[8].mxu0 %v2973_v51 }
 0x526   :  { %2010 = vmatpush1.bf16.msra.mxu0 %v2666_v56  ;;  %v2313_v56 = vld [vmem:[%s3006_s7 + $0xc] sm:$0x3] }
 0x527   :  { %2011 = vmatprep.subr.bf16.mxu0 %v2671_v58  ;;  %v1842_v57 = vrot.slane %v2313_v56, %v2910_v34  ;;  %v1846_v58 = vrot.slane %v2313_v56, %v2912_v35 }
 0x52a   :  { %2012 = vmatpush1.bf16.msra.mxu0 %v2669_v59 }
 0x52b   :  { %2013 = vmatprep.subr.bf16.mxu0 %v2674_v60 }
 0x52e   :  { %2014 = vmatpush1.bf16.msra.mxu0 %v2672_v61 }
 0x52f   :  { %2015 = vmatprep.subr.bf16.mxu0 %v2677_v62 }
 0x532   :  { %2016 = vmatpush1.bf16.msra.mxu0 %v2675_v63 }
 0x533   :  { %2017 = vmatprep.subr.bf16.mxu0 %v2680_v0 }
 0x536   :  { %2018 = vmatpush1.bf16.msra.mxu0 %v2678_v1 }
 0x537   :  { %2019 = vmatprep.subr.bf16.mxu0 %v2683_v2 }
 0x53a   :  { %2020 = vmatpush1.bf16.msra.mxu0 %v2681_v3  ;;  %v2058_v3 = vld [vmem:[#allocation5] sm:$0x3] }
 0x53b   :  { %2021 = vmatprep.subr.bf16.mxu0 %v2686_v4 }
 0x53e   :  { %2022 = vmatpush1.bf16.msra.mxu0 %v2684_v5 }
 0x53f   :  { %2023 = vmatprep.subr.bf16.mxu0 %v2689_v6 }
 0x542   :  { %2024 = vmatpush1.bf16.msra.mxu0 %v2687_v7  ;;  %v2063_v7 = vrot.slane %v2058_v3, %v2910_v34 }
 0x543   :  { %2025 = vmatprep.subr.bf16.mxu0 %v2692_v8 }
 0x546   :  { %2026 = vmatpush1.bf16.msra.mxu0 %v2690_v9  ;;  %v2067_v9 = vrot.slane %v2058_v3, %v2912_v35 }
 0x547   :  { %2027 = vmatprep.subr.bf16.mxu0 %v2695_v10 }
 0x54a   :  { %2028 = vmatpush1.bf16.msra.mxu0 %v2693_v11 }
 0x54b   :  { %2029 = vmatprep.subr.bf16.mxu0 %v2698_v12 }
 0x54e   :  { %2030 = vmatpush1.bf16.msra.mxu0 %v2696_v13 }
 0x54f   :  { %2031 = vmatprep.subr.bf16.mxu0 %v2701_v14 }
 0x552   :  { %2032 = vmatpush1.bf16.msra.mxu0 %v2699_v15  ;;  %v2346_v15 = vld [vmem:[#allocation2] ss:$0 sm:$0xff] }
 0x553   :  { %2033 = vmatprep.subr.bf16.mxu0 %v2704_v16 }
 0x556   :  { %2034 = vmatpush1.bf16.msra.mxu0 %v2702_v17 }
 0x557   :  { %2035 = vmatprep.subr.bf16.mxu0 %v2707_v18 }
 0x55a   :  { %2036 = vmatpush1.bf16.msra.mxu0 %v2705_v19 }
 0x55b   :  { %2037 = vmatprep.subr.bf16.mxu0 %v2710_v38 }
 0x55e   :  { %2038 = vmatpush1.bf16.msra.mxu0 %v2708_v39 }
 0x55f   :  { %2039 = vmatprep.subr.bf16.mxu0 %v2713_v40 }
 0x562   :  { %2040 = vmatpush1.bf16.msra.mxu0 %v2711_v41 }
 0x5f8   :  { %v1537_v24 = vpop.f32.mrb[8].mxu0 }
 0x5f9   :  { %v1538_v25 = vadd.f32 %v1537_v24, %v1336_v21  ;;  %v1539_v26 = vpop.f32.mrb[9].mxu0 }
 0x5fa   :  { %v1540_v27 = vadd.f32 %v1539_v26, %v1340_v23  ;;  %v1541_v28 = vpop.f32.mrb[10].mxu0 }
 0x5fb   :  { %v1544_v29 = vmax.f32 %v1538_v25, 0.0  ;;  %v1542_v30 = vpop.f32.mrb[11].mxu0 }
 0x5fc   :  { %v1545_v31 = vmax.f32 %v1540_v27, 0.0 }
 0x5fd   :  { %v1546_v32 = vpack.c.bf16 %v1544_v29, %v1544_v29 }
 0x5fe   :  { %v1547_v33 = vpack.c.bf16 %v1545_v31, %v1545_v31 }
 0x5ff   :  { %v1548_v37 = vadd.bf16 %v1546_v32, %v2973_v51 }
 0x600   :  { %v1549_v36 = vadd.bf16 %v1547_v33, %v2970_v50 }
 0x602   :  { %1788 = vmatprep.mubr.bf16.mxu1 %v1549_v36 }
 0x603   :  { %1789 = vmatmul.mubr.bf16.vlgmr.msra.gmra.mrb[16].mxu1 %v1548_v37 }
 0x6d6   :  { %v1790_v45 = vpop.f32.mrb[16].mxu1 }
 0x6d7   :  { %v1791_v22 = vadd.f32 %v1790_v45, %v1589_v43  ;;  %v1792_v46 = vpop.f32.mrb[17].mxu1 }
 0x6d8   :  { %v1793_v47 = vadd.f32 %v1792_v46, %v1593_v44  ;;  %v1794_v48 = vpop.f32.mrb[18].mxu1 }
 0x6d9   :  { %v1797_v49 = vmax.f32 %v1791_v22, 0.0  ;;  %v1795_v50 = vpop.f32.mrb[19].mxu1 }
 0x6da   :  { %v1798_v51 = vmax.f32 %v1793_v47, 0.0 }
 0x6db   :  { %v1799_v52 = vpack.c.bf16 %v1797_v49, %v1797_v49 }
 0x6dc   :  { %v1800_v53 = vpack.c.bf16 %v1798_v51, %v1798_v51 }
 0x6dd   :  { %v1801_v55 = vadd.bf16 %v1799_v52, %v1548_v37 }
 0x6de   :  { %v1802_v54 = vadd.bf16 %v1800_v53, %v1549_v36 }
 0x6e0   :  { %2041 = vmatprep.mubr.bf16.mxu0 %v1802_v54 }
 0x6e1   :  { %2042 = vmatmul.mubr.bf16.vlgmr.msra.gmra.mrb[12].mxu0 %v1801_v55 }
 0x7b4   :  { %v2043_v59 = vpop.f32.mrb[12].mxu0 }
 0x7b5   :  { %v2044_v60 = vadd.f32 %v2043_v59, %v1842_v57  ;;  %v2045_v61 = vpop.f32.mrb[13].mxu0 }
 0x7b6   :  { %v2046_v62 = vadd.f32 %v2045_v61, %v1846_v58  ;;  %v2047_v63 = vpop.f32.mrb[14].mxu0 }
 0x7b7   :  { %v2050_v0 = vmax.f32 %v2044_v60, 0.0  ;;  %v2048_v1 = vpop.f32.mrb[15].mxu0 }
 0x7b8   :  { %v2051_v2 = vmax.f32 %v2046_v62, 0.0 }
 0x7b9   :  { %v2052_v4 = vpack.c.bf16 %v2050_v0, %v2050_v0 }
 0x7ba   :  { %v2053_v5 = vpack.c.bf16 %v2051_v2, %v2051_v2 }
 0x7bb   :  { %v2054_v6 = vadd.bf16 %v2052_v4, %v1801_v55 }
 0x7bc   :  { %v2055_v8 = vadd.bf16 %v2053_v5, %v1802_v54 }
 0x7bd   :  { %v2056_v10 = vunpack.c.l.bf16 %v2054_v6 }
 0x7be   :  { %v2057_v11 = vunpack.c.l.bf16 %v2055_v8 }
 0x7bf   :  { %v2070_v12 = vmul.f32 %v2063_v7, %v2056_v10 }
 0x7c0   :  { %v2071_v13 = vmul.f32 %v2067_v9, %v2057_v11 }
 0x7c2   :  { %v2072_v14 = vadd.f32 %v2071_v13, %v2070_v12 }
 0x7c4   :  { %2073 = vadd.xlane.f32.xlu1 %v2072_v14 }
 0x851   :  { %v2074_v16 = vpop.xlane.xlu1 %2073 }
 0x852   :  { %v2082_v17 = vadd.f32 %v2346_v15, %v2074_v16 }
 0x854   :  { %v2347_v18 = vmul.f32 -1.442695, %v2082_v17 }
 0x856   :  { %2714 = vpow2.f32 %v2347_v18 }
 0x860   :  { %v2715_v19 = vpop.eup %2714 }
 0x861   :  { %v2086_v20 = vadd.f32 1.0, %v2715_v19 }
 0x863   :  { %2716 = vrcp.f32 %v2086_v20 }
 0x86d   :  { %v2717_v21 = vpop.eup %2716 }
 0x86e   :  { %2090 = vst.msk [vmem:[%s3009_s10] sm:$0xff] %vm2089_vm6, %v2717_v21 }
 0x86f   :  { %2095 = vsyncpa [#allocation4], 1 }
 0x870   :  { %2096 = vsyncpa [#allocation6], 1 }

</bundles_post_ra>
